<compile_context>
chip_gen: v5e
topology: v5e:2x2
jax: 0.10.0
libtpu: 0.0.40
codegen_flags: <defaults>
</compile_context>

<pallas_src>
import functools

import jax
import jax.numpy as jnp
from jax.experimental import pallas as pl
from jax.experimental.pallas import tpu as pltpu

EPS = 1e-5  # nn.BatchNorm1d default eps
LANE = 128


# ---------------------------------------------------------------------------
# Kernel
# ---------------------------------------------------------------------------
def residual_mlp_bn_kernel(num_blocks,
                           x_ref, w_in_ref, b_in_ref,
                           w1_ref, b1_ref, w2_ref, b2_ref,
                           w_out_ref, b_out_ref,
                           o_ref, h_ref):
    # input_layer: [TILE_N, D] @ [D, H] + [1, H]  -> VMEM scratch accumulator
    h_ref[...] = (jnp.dot(x_ref[...], w_in_ref[...],
                          preferred_element_type=jnp.float32)
                  + b_in_ref[...])

    # Residual blocks (BN already folded into w1/b1 and w2/b2); unrolled at
    # trace time (num_blocks is a Python int).
    for b in range(num_blocks):
        h = h_ref[...]
        out = jnp.maximum(
            jnp.dot(h, w1_ref[b], preferred_element_type=jnp.float32) + b1_ref[b],
            0.0)                                                      # ReLU
        out = jnp.dot(out, w2_ref[b],
                      preferred_element_type=jnp.float32) + b2_ref[b]
        h_ref[...] = jnp.maximum(out + h, 0.0)                        # ReLU(out + x)

    # Dropout: identity in eval mode.
    # output_layer written as a lane-dense (TILE_N, 128) slab; col 0 is real.
    o_ref[...] = (jnp.dot(h_ref[...], w_out_ref[...],
                          preferred_element_type=jnp.float32)
                  + b_out_ref[...])


# ---------------------------------------------------------------------------
# Wrapper helpers
# ---------------------------------------------------------------------------
def _round_up(x, m):
    return ((x + m - 1) // m) * m


def _pad_last2(a, rows, cols):
    pads = [(0, 0)] * (a.ndim - 2) + [(0, rows - a.shape[-2]),
                                      (0, cols - a.shape[-1])]
    return jnp.pad(a, pads)


def _fold_bn_into_linear(w, b, gamma, beta, mean, var):
    """Fold eval-mode BatchNorm1d into the preceding Linear (x @ w + b)."""
    scale = gamma * jax.lax.rsqrt(var + EPS)          # (..., 1, H): per out-col
    return w * scale, (b - mean) * scale + beta


def residual_mlp_bn(x, params, num_blocks, *, tile_n=128):
    n, d_in = x.shape
    hidden = params["w_in"].shape[1]

    tile_n = min(tile_n, _round_up(n, 8))             # sublane-aligned tile
    n_pad = _round_up(n, tile_n)
    d_pad = _round_up(d_in, LANE)
    h_pad = _round_up(hidden, LANE)
    o_pad = LANE                                      # lane-dense output slab

    # Fold BN into the per-block linears, then zero-pad everything. Padded
    # rows/cols are zero so padded features stay exactly zero through every
    # block (ReLU(0) == 0) and do not perturb the real columns.
    w1f, b1f = _fold_bn_into_linear(params["w1"], params["b1"], params["g1"],
                                    params["be1"], params["m1"], params["v1"])
    w2f, b2f = _fold_bn_into_linear(params["w2"], params["b2"], params["g2"],
                                    params["be2"], params["m2"], params["v2"])

    x_p = _pad_last2(x, n_pad, d_pad)
    w_in_p = _pad_last2(params["w_in"], d_pad, h_pad)
    b_in_p = _pad_last2(params["b_in"], 1, h_pad)
    w1_p, b1_p = _pad_last2(w1f, h_pad, h_pad), _pad_last2(b1f, 1, h_pad)
    w2_p, b2_p = _pad_last2(w2f, h_pad, h_pad), _pad_last2(b2f, 1, h_pad)
    w_out_p = _pad_last2(params["w_out"], h_pad, o_pad)
    b_out_p = _pad_last2(params["b_out"], 1, o_pad)

    inputs = (x_p, w_in_p, b_in_p, w1_p, b1_p, w2_p, b2_p, w_out_p, b_out_p)

    resident2 = lambda i: (0, 0)                      # weights: VMEM-resident
    resident3 = lambda i: (0, 0, 0)
    in_specs = [
        pl.BlockSpec((tile_n, d_pad), lambda i: (i, 0)),          # x tile
        pl.BlockSpec((d_pad, h_pad), resident2),                  # w_in
        pl.BlockSpec((1, h_pad), resident2),                      # b_in
        pl.BlockSpec((num_blocks, h_pad, h_pad), resident3),      # w1 (folded)
        pl.BlockSpec((num_blocks, 1, h_pad), resident3),          # b1 (folded)
        pl.BlockSpec((num_blocks, h_pad, h_pad), resident3),      # w2 (folded)
        pl.BlockSpec((num_blocks, 1, h_pad), resident3),          # b2 (folded)
        pl.BlockSpec((h_pad, o_pad), resident2),                  # w_out
        pl.BlockSpec((1, o_pad), resident2),                      # b_out
    ]
    out_spec = pl.BlockSpec((tile_n, o_pad), lambda i: (i, 0))

    # Explicit scoped-VMEM budget: 2x for double buffering + scratch + margin.
    param_bytes = sum(int(a.size) * 4 for a in inputs[1:])
    act_bytes = (tile_n * d_pad + tile_n * o_pad) * 4
    scratch_bytes = tile_n * h_pad * 4
    vmem_budget = 2 * (param_bytes + act_bytes) + scratch_bytes + (4 << 20)
    vmem_budget = int(min(max(vmem_budget, 32 << 20), 128 << 20))

    out = pl.pallas_call(
        functools.partial(residual_mlp_bn_kernel, num_blocks),
        out_shape=jax.ShapeDtypeStruct((n_pad, o_pad), jnp.float32),
        grid=(pl.cdiv(n_pad, tile_n),),
        in_specs=in_specs,
        out_specs=out_spec,
        scratch_shapes=[pltpu.VMEM((tile_n, h_pad), jnp.float32)],
        compiler_params=pltpu.CompilerParams(
            dimension_semantics=("parallel",),
            vmem_limit_bytes=vmem_budget),
    )(*inputs)

    return out[:n, :1]


# ---------------------------------------------------------------------------
# Pure-JAX reference (unfused BN, unpadded) and param init
# ---------------------------------------------------------------------------
def _bn_eval(x, gamma, beta, mean, var):
    return (x - mean) * (gamma * jax.lax.rsqrt(var + EPS)) + beta


def residual_mlp_bn_ref(x, params, num_blocks):
    h = x @ params["w_in"] + params["b_in"]
    for b in range(num_blocks):
        out = h @ params["w1"][b] + params["b1"][b]
        out = _bn_eval(out, params["g1"][b], params["be1"][b],
                       params["m1"][b], params["v1"][b])
        out = jnp.maximum(out, 0.0)
        out = out @ params["w2"][b] + params["b2"][b]
        out = _bn_eval(out, params["g2"][b], params["be2"][b],
                       params["m2"][b], params["v2"][b])
        h = jnp.maximum(out + h, 0.0)
    return h @ params["w_out"] + params["b_out"]


def init_params(key, input_dim, hidden_dim, num_blocks):
    ks = jax.random.split(key, 16)

    def rn(k, shape, scale=0.2):
        return (scale * jax.random.normal(k, shape)).astype(jnp.float32)

    def pos(k, shape):  # positive running-variance
        return jax.random.uniform(k, shape, jnp.float32, 0.5, 1.5)

    B, H = num_blocks, hidden_dim
    return {
        # input_layer: Linear(input_dim, hidden_dim)  (weight stored transposed)
        "w_in": rn(ks[0], (input_dim, H)),
        "b_in": rn(ks[1], (1, H)),
        # per-block linear1 / bn1
        "w1": rn(ks[2], (B, H, H)),
        "b1": rn(ks[3], (B, 1, H)),
        "g1": 1.0 + rn(ks[4], (B, 1, H), 0.1),
        "be1": rn(ks[5], (B, 1, H)),
        "m1": rn(ks[6], (B, 1, H)),
        "v1": pos(ks[7], (B, 1, H)),
        # per-block linear2 / bn2
        "w2": rn(ks[8], (B, H, H)),
        "b2": rn(ks[9], (B, 1, H)),
        "g2": 1.0 + rn(ks[10], (B, 1, H), 0.1),
        "be2": rn(ks[11], (B, 1, H)),
        "m2": rn(ks[12], (B, 1, H)),
        "v2": pos(ks[13], (B, 1, H)),
        # output_layer: Linear(hidden_dim, 1)
        "w_out": rn(ks[14], (H, 1)),
        "b_out": rn(ks[15], (1, 1)),
    }


if __name__ == "__main__":
    INPUT_DIM = 4
    HIDDEN_DIM = 64
    NUM_BLOCKS = 3
    BATCH = 256       # grid of 2 batch tiles of 128

    key = jax.random.PRNGKey(0)
    k_x, k_p = jax.random.split(key)
    x = jax.random.normal(k_x, (BATCH, INPUT_DIM), dtype=jnp.float32)
    params = init_params(k_p, INPUT_DIM, HIDDEN_DIM, NUM_BLOCKS)

    out = residual_mlp_bn(x, params, NUM_BLOCKS)
    out = jax.block_until_ready(out)

    ref = residual_mlp_bn_ref(x, params, NUM_BLOCKS)
    assert out.shape == (BATCH, 1), out.shape
    max_err = float(jnp.max(jnp.abs(out - ref)))
    assert jnp.allclose(out, ref, atol=1e-3, rtol=1e-3), f"mismatch: {max_err}"

    print("KERNEL_OK")
</pallas_src>

<mosaic_0001>
module attributes {stable_mosaic.version = 11 : i64} {
  func.func @residual_mlp_bn_kernel(%arg0: i32, %arg1: memref<128x128xf32, #tpu.memory_space<vmem>>, %arg2: memref<128x128xf32, #tpu.memory_space<vmem>>, %arg3: memref<1x128xf32, #tpu.memory_space<vmem>>, %arg4: memref<3x128x128xf32, #tpu.memory_space<vmem>>, %arg5: memref<3x1x128xf32, #tpu.memory_space<vmem>>, %arg6: memref<3x128x128xf32, #tpu.memory_space<vmem>>, %arg7: memref<3x1x128xf32, #tpu.memory_space<vmem>>, %arg8: memref<128x128xf32, #tpu.memory_space<vmem>>, %arg9: memref<1x128xf32, #tpu.memory_space<vmem>>, %arg10: memref<128x128xf32, #tpu.memory_space<vmem>>, %arg11: memref<128x128xf32, #tpu.memory_space<vmem>>) attributes {dimension_semantics = [#tpu.dimension_semantics<parallel>], iteration_bounds = array<i64: 2>, scalar_prefetch = 0 : i64, scratch_operands = 1 : i64, tpu.core_type = #tpu.core_type<tc>, window_params = [{transform_indices = @transform_0, window_bounds = array<i64: 128, 128>}, {pipeline_mode = #tpu.pipeline_mode<synchronous>, transform_indices = @transform_1, window_bounds = array<i64: 128, 128>}, {pipeline_mode = #tpu.pipeline_mode<synchronous>, transform_indices = @transform_2, window_bounds = array<i64: 1, 128>}, {pipeline_mode = #tpu.pipeline_mode<synchronous>, transform_indices = @transform_3, window_bounds = array<i64: 3, 128, 128>}, {pipeline_mode = #tpu.pipeline_mode<synchronous>, transform_indices = @transform_4, window_bounds = array<i64: 3, 1, 128>}, {pipeline_mode = #tpu.pipeline_mode<synchronous>, transform_indices = @transform_5, window_bounds = array<i64: 3, 128, 128>}, {pipeline_mode = #tpu.pipeline_mode<synchronous>, transform_indices = @transform_6, window_bounds = array<i64: 3, 1, 128>}, {pipeline_mode = #tpu.pipeline_mode<synchronous>, transform_indices = @transform_7, window_bounds = array<i64: 128, 128>}, {pipeline_mode = #tpu.pipeline_mode<synchronous>, transform_indices = @transform_8, window_bounds = array<i64: 1, 128>}, {transform_indices = @transform_9, window_bounds = array<i64: 128, 128>}]} {
    %c0 = arith.constant 0 : index
    %c0_0 = arith.constant 0 : index
    %0 = vector.load %arg1[%c0, %c0_0] : memref<128x128xf32, #tpu.memory_space<vmem>>, vector<128x128xf32>
    %c0_1 = arith.constant 0 : index
    %c0_2 = arith.constant 0 : index
    %1 = vector.load %arg2[%c0_1, %c0_2] : memref<128x128xf32, #tpu.memory_space<vmem>>, vector<128x128xf32>
    %cst = arith.constant dense<0.000000e+00> : vector<128x128xf32>
    %2 = tpu.matmul %0, %1, %cst {dimension_numbers = #tpu.dot_dimension_numbers<[1], [0], [0], [1], [0, 0, 1, 1], [], []>} : vector<128x128xf32>, vector<128x128xf32>, vector<128x128xf32> -> vector<128x128xf32>
    %c0_3 = arith.constant 0 : index
    %c0_4 = arith.constant 0 : index
    %3 = vector.load %arg3[%c0_3, %c0_4] : memref<1x128xf32, #tpu.memory_space<vmem>>, vector<1x128xf32>
    %4 = vector.broadcast %3 : vector<1x128xf32> to vector<128x128xf32>
    %5 = arith.addf %2, %4 : vector<128x128xf32>
    %c0_5 = arith.constant 0 : index
    %c0_6 = arith.constant 0 : index
    %6 = vector.load %arg11[%c0_5, %c0_6] : memref<128x128xf32, #tpu.memory_space<vmem>>, vector<128x128xf32>
    tpu.vector_store %arg11[%c0_5, %c0_6], %5 {strides = array<i32>} : memref<128x128xf32, #tpu.memory_space<vmem>>, vector<128x128xf32>,
    %c0_7 = arith.constant 0 : index
    %c0_8 = arith.constant 0 : index
    %7 = vector.load %arg11[%c0_7, %c0_8] : memref<128x128xf32, #tpu.memory_space<vmem>>, vector<128x128xf32>
    %c0_9 = arith.constant 0 : index
    %c0_10 = arith.constant 0 : index
    %c0_11 = arith.constant 0 : index
    %8 = vector.load %arg4[%c0_9, %c0_10, %c0_11] : memref<3x128x128xf32, #tpu.memory_space<vmem>>, vector<1x128x128xf32>
    %9 = vector.shape_cast %8 : vector<1x128x128xf32> to vector<128x128xf32>
    %cst_12 = arith.constant dense<0.000000e+00> : vector<128x128xf32>
    %10 = tpu.matmul %7, %9, %cst_12 {dimension_numbers = #tpu.dot_dimension_numbers<[1], [0], [0], [1], [0, 0, 1, 1], [], []>} : vector<128x128xf32>, vector<128x128xf32>, vector<128x128xf32> -> vector<128x128xf32>
    %c0_13 = arith.constant 0 : index
    %c0_14 = arith.constant 0 : index
    %c0_15 = arith.constant 0 : index
    %11 = vector.load %arg5[%c0_13, %c0_14, %c0_15] : memref<3x1x128xf32, #tpu.memory_space<vmem>>, vector<1x1x128xf32>
    %12 = vector.shape_cast %11 : vector<1x1x128xf32> to vector<1x128xf32>
    %13 = vector.broadcast %12 : vector<1x128xf32> to vector<128x128xf32>
    %14 = arith.addf %10, %13 : vector<128x128xf32>
    %cst_16 = arith.constant 0.000000e+00 : f32
    %15 = vector.broadcast %cst_16 : f32 to vector<128x128xf32>
    %16 = arith.maximumf %14, %15 : vector<128x128xf32>
    %c0_17 = arith.constant 0 : index
    %c0_18 = arith.constant 0 : index
    %c0_19 = arith.constant 0 : index
    %17 = vector.load %arg6[%c0_17, %c0_18, %c0_19] : memref<3x128x128xf32, #tpu.memory_space<vmem>>, vector<1x128x128xf32>
    %18 = vector.shape_cast %17 : vector<1x128x128xf32> to vector<128x128xf32>
    %cst_20 = arith.constant dense<0.000000e+00> : vector<128x128xf32>
    %19 = tpu.matmul %16, %18, %cst_20 {dimension_numbers = #tpu.dot_dimension_numbers<[1], [0], [0], [1], [0, 0, 1, 1], [], []>} : vector<128x128xf32>, vector<128x128xf32>, vector<128x128xf32> -> vector<128x128xf32>
    %c0_21 = arith.constant 0 : index
    %c0_22 = arith.constant 0 : index
    %c0_23 = arith.constant 0 : index
    %20 = vector.load %arg7[%c0_21, %c0_22, %c0_23] : memref<3x1x128xf32, #tpu.memory_space<vmem>>, vector<1x1x128xf32>
    %21 = vector.shape_cast %20 : vector<1x1x128xf32> to vector<1x128xf32>
    %22 = vector.broadcast %21 : vector<1x128xf32> to vector<128x128xf32>
    %23 = arith.addf %19, %22 : vector<128x128xf32>
    %24 = arith.addf %23, %7 : vector<128x128xf32>
    %cst_24 = arith.constant 0.000000e+00 : f32
    %25 = vector.broadcast %cst_24 : f32 to vector<128x128xf32>
    %26 = arith.maximumf %24, %25 : vector<128x128xf32>
    %c0_25 = arith.constant 0 : index
    %c0_26 = arith.constant 0 : index
    %27 = vector.load %arg11[%c0_25, %c0_26] : memref<128x128xf32, #tpu.memory_space<vmem>>, vector<128x128xf32>
    tpu.vector_store %arg11[%c0_25, %c0_26], %26 {strides = array<i32>} : memref<128x128xf32, #tpu.memory_space<vmem>>, vector<128x128xf32>,
    %c0_27 = arith.constant 0 : index
    %c0_28 = arith.constant 0 : index
    %28 = vector.load %arg11[%c0_27, %c0_28] : memref<128x128xf32, #tpu.memory_space<vmem>>, vector<128x128xf32>
    %c1 = arith.constant 1 : index
    %c0_29 = arith.constant 0 : index
    %c0_30 = arith.constant 0 : index
    %29 = vector.load %arg4[%c1, %c0_29, %c0_30] : memref<3x128x128xf32, #tpu.memory_space<vmem>>, vector<1x128x128xf32>
    %30 = vector.shape_cast %29 : vector<1x128x128xf32> to vector<128x128xf32>
    %cst_31 = arith.constant dense<0.000000e+00> : vector<128x128xf32>
    %31 = tpu.matmul %28, %30, %cst_31 {dimension_numbers = #tpu.dot_dimension_numbers<[1], [0], [0], [1], [0, 0, 1, 1], [], []>} : vector<128x128xf32>, vector<128x128xf32>, vector<128x128xf32> -> vector<128x128xf32>
    %c1_32 = arith.constant 1 : index
    %c0_33 = arith.constant 0 : index
    %c0_34 = arith.constant 0 : index
    %32 = vector.load %arg5[%c1_32, %c0_33, %c0_34] : memref<3x1x128xf32, #tpu.memory_space<vmem>>, vector<1x1x128xf32>
    %33 = vector.shape_cast %32 : vector<1x1x128xf32> to vector<1x128xf32>
    %34 = vector.broadcast %33 : vector<1x128xf32> to vector<128x128xf32>
    %35 = arith.addf %31, %34 : vector<128x128xf32>
    %cst_35 = arith.constant 0.000000e+00 : f32
    %36 = vector.broadcast %cst_35 : f32 to vector<128x128xf32>
    %37 = arith.maximumf %35, %36 : vector<128x128xf32>
    %c1_36 = arith.constant 1 : index
    %c0_37 = arith.constant 0 : index
    %c0_38 = arith.constant 0 : index
    %38 = vector.load %arg6[%c1_36, %c0_37, %c0_38] : memref<3x128x128xf32, #tpu.memory_space<vmem>>, vector<1x128x128xf32>
    %39 = vector.shape_cast %38 : vector<1x128x128xf32> to vector<128x128xf32>
    %cst_39 = arith.constant dense<0.000000e+00> : vector<128x128xf32>
    %40 = tpu.matmul %37, %39, %cst_39 {dimension_numbers = #tpu.dot_dimension_numbers<[1], [0], [0], [1], [0, 0, 1, 1], [], []>} : vector<128x128xf32>, vector<128x128xf32>, vector<128x128xf32> -> vector<128x128xf32>
    %c1_40 = arith.constant 1 : index
    %c0_41 = arith.constant 0 : index
    %c0_42 = arith.constant 0 : index
    %41 = vector.load %arg7[%c1_40, %c0_41, %c0_42] : memref<3x1x128xf32, #tpu.memory_space<vmem>>, vector<1x1x128xf32>
    %42 = vector.shape_cast %41 : vector<1x1x128xf32> to vector<1x128xf32>
    %43 = vector.broadcast %42 : vector<1x128xf32> to vector<128x128xf32>
    %44 = arith.addf %40, %43 : vector<128x128xf32>
    %45 = arith.addf %44, %28 : vector<128x128xf32>
    %cst_43 = arith.constant 0.000000e+00 : f32
    %46 = vector.broadcast %cst_43 : f32 to vector<128x128xf32>
    %47 = arith.maximumf %45, %46 : vector<128x128xf32>
    %c0_44 = arith.constant 0 : index
    %c0_45 = arith.constant 0 : index
    %48 = vector.load %arg11[%c0_44, %c0_45] : memref<128x128xf32, #tpu.memory_space<vmem>>, vector<128x128xf32>
    tpu.vector_store %arg11[%c0_44, %c0_45], %47 {strides = array<i32>} : memref<128x128xf32, #tpu.memory_space<vmem>>, vector<128x128xf32>,
    %c0_46 = arith.constant 0 : index
    %c0_47 = arith.constant 0 : index
    %49 = vector.load %arg11[%c0_46, %c0_47] : memref<128x128xf32, #tpu.memory_space<vmem>>, vector<128x128xf32>
    %c2 = arith.constant 2 : index
    %c0_48 = arith.constant 0 : index
    %c0_49 = arith.constant 0 : index
    %50 = vector.load %arg4[%c2, %c0_48, %c0_49] : memref<3x128x128xf32, #tpu.memory_space<vmem>>, vector<1x128x128xf32>
    %51 = vector.shape_cast %50 : vector<1x128x128xf32> to vector<128x128xf32>
    %cst_50 = arith.constant dense<0.000000e+00> : vector<128x128xf32>
    %52 = tpu.matmul %49, %51, %cst_50 {dimension_numbers = #tpu.dot_dimension_numbers<[1], [0], [0], [1], [0, 0, 1, 1], [], []>} : vector<128x128xf32>, vector<128x128xf32>, vector<128x128xf32> -> vector<128x128xf32>
    %c2_51 = arith.constant 2 : index
    %c0_52 = arith.constant 0 : index
    %c0_53 = arith.constant 0 : index
    %53 = vector.load %arg5[%c2_51, %c0_52, %c0_53] : memref<3x1x128xf32, #tpu.memory_space<vmem>>, vector<1x1x128xf32>
    %54 = vector.shape_cast %53 : vector<1x1x128xf32> to vector<1x128xf32>
    %55 = vector.broadcast %54 : vector<1x128xf32> to vector<128x128xf32>
    %56 = arith.addf %52, %55 : vector<128x128xf32>
    %cst_54 = arith.constant 0.000000e+00 : f32
    %57 = vector.broadcast %cst_54 : f32 to vector<128x128xf32>
    %58 = arith.maximumf %56, %57 : vector<128x128xf32>
    %c2_55 = arith.constant 2 : index
    %c0_56 = arith.constant 0 : index
    %c0_57 = arith.constant 0 : index
    %59 = vector.load %arg6[%c2_55, %c0_56, %c0_57] : memref<3x128x128xf32, #tpu.memory_space<vmem>>, vector<1x128x128xf32>
    %60 = vector.shape_cast %59 : vector<1x128x128xf32> to vector<128x128xf32>
    %cst_58 = arith.constant dense<0.000000e+00> : vector<128x128xf32>
    %61 = tpu.matmul %58, %60, %cst_58 {dimension_numbers = #tpu.dot_dimension_numbers<[1], [0], [0], [1], [0, 0, 1, 1], [], []>} : vector<128x128xf32>, vector<128x128xf32>, vector<128x128xf32> -> vector<128x128xf32>
    %c2_59 = arith.constant 2 : index
    %c0_60 = arith.constant 0 : index
    %c0_61 = arith.constant 0 : index
    %62 = vector.load %arg7[%c2_59, %c0_60, %c0_61] : memref<3x1x128xf32, #tpu.memory_space<vmem>>, vector<1x1x128xf32>
    %63 = vector.shape_cast %62 : vector<1x1x128xf32> to vector<1x128xf32>
    %64 = vector.broadcast %63 : vector<1x128xf32> to vector<128x128xf32>
    %65 = arith.addf %61, %64 : vector<128x128xf32>
    %66 = arith.addf %65, %49 : vector<128x128xf32>
    %cst_62 = arith.constant 0.000000e+00 : f32
    %67 = vector.broadcast %cst_62 : f32 to vector<128x128xf32>
    %68 = arith.maximumf %66, %67 : vector<128x128xf32>
    %c0_63 = arith.constant 0 : index
    %c0_64 = arith.constant 0 : index
    %69 = vector.load %arg11[%c0_63, %c0_64] : memref<128x128xf32, #tpu.memory_space<vmem>>, vector<128x128xf32>
    tpu.vector_store %arg11[%c0_63, %c0_64], %68 {strides = array<i32>} : memref<128x128xf32, #tpu.memory_space<vmem>>, vector<128x128xf32>,
    %c0_65 = arith.constant 0 : index
    %c0_66 = arith.constant 0 : index
    %70 = vector.load %arg11[%c0_65, %c0_66] : memref<128x128xf32, #tpu.memory_space<vmem>>, vector<128x128xf32>
    %c0_67 = arith.constant 0 : index
    %c0_68 = arith.constant 0 : index
    %71 = vector.load %arg8[%c0_67, %c0_68] : memref<128x128xf32, #tpu.memory_space<vmem>>, vector<128x128xf32>
    %cst_69 = arith.constant dense<0.000000e+00> : vector<128x128xf32>
    %72 = tpu.matmul %70, %71, %cst_69 {dimension_numbers = #tpu.dot_dimension_numbers<[1], [0], [0], [1], [0, 0, 1, 1], [], []>} : vector<128x128xf32>, vector<128x128xf32>, vector<128x128xf32> -> vector<128x128xf32>
    %c0_70 = arith.constant 0 : index
    %c0_71 = arith.constant 0 : index
    %73 = vector.load %arg9[%c0_70, %c0_71] : memref<1x128xf32, #tpu.memory_space<vmem>>, vector<1x128xf32>
    %74 = vector.broadcast %73 : vector<1x128xf32> to vector<128x128xf32>
    %75 = arith.addf %72, %74 : vector<128x128xf32>
    %c0_72 = arith.constant 0 : index
    %c0_73 = arith.constant 0 : index
    %76 = vector.load %arg10[%c0_72, %c0_73] : memref<128x128xf32, #tpu.memory_space<vmem>>, vector<128x128xf32>
    tpu.vector_store %arg10[%c0_72, %c0_73], %75 {strides = array<i32>} : memref<128x128xf32, #tpu.memory_space<vmem>>, vector<128x128xf32>,
    return
  }
  func.func @transform_0(%arg0: i32) -> (i32, i32) {
    %c0_i32 = arith.constant 0 : i32
    %c0_i32_0 = arith.constant 0 : i32
    return %arg0, %c0_i32 : i32, i32
  }
  func.func @transform_1(%arg0: i32) -> (i32, i32) {
    %c0_i32 = arith.constant 0 : i32
    %c0_i32_0 = arith.constant 0 : i32
    %c0_i32_1 = arith.constant 0 : i32
    return %c0_i32, %c0_i32_0 : i32, i32
  }
  func.func @transform_2(%arg0: i32) -> (i32, i32) {
    %c0_i32 = arith.constant 0 : i32
    %c0_i32_0 = arith.constant 0 : i32
    %c0_i32_1 = arith.constant 0 : i32
    return %c0_i32, %c0_i32_0 : i32, i32
  }
  func.func @transform_3(%arg0: i32) -> (i32, i32, i32) {
    %c0_i32 = arith.constant 0 : i32
    %c0_i32_0 = arith.constant 0 : i32
    %c0_i32_1 = arith.constant 0 : i32
    %c0_i32_2 = arith.constant 0 : i32
    return %c0_i32, %c0_i32_0, %c0_i32_1 : i32, i32, i32
  }
  func.func @transform_4(%arg0: i32) -> (i32, i32, i32) {
    %c0_i32 = arith.constant 0 : i32
    %c0_i32_0 = arith.constant 0 : i32
    %c0_i32_1 = arith.constant 0 : i32
    %c0_i32_2 = arith.constant 0 : i32
    return %c0_i32, %c0_i32_0, %c0_i32_1 : i32, i32, i32
  }
  func.func @transform_5(%arg0: i32) -> (i32, i32, i32) {
    %c0_i32 = arith.constant 0 : i32
    %c0_i32_0 = arith.constant 0 : i32
    %c0_i32_1 = arith.constant 0 : i32
    %c0_i32_2 = arith.constant 0 : i32
    return %c0_i32, %c0_i32_0, %c0_i32_1 : i32, i32, i32
  }
  func.func @transform_6(%arg0: i32) -> (i32, i32, i32) {
    %c0_i32 = arith.constant 0 : i32
    %c0_i32_0 = arith.constant 0 : i32
    %c0_i32_1 = arith.constant 0 : i32
    %c0_i32_2 = arith.constant 0 : i32
    return %c0_i32, %c0_i32_0, %c0_i32_1 : i32, i32, i32
  }
  func.func @transform_7(%arg0: i32) -> (i32, i32) {
    %c0_i32 = arith.constant 0 : i32
    %c0_i32_0 = arith.constant 0 : i32
    %c0_i32_1 = arith.constant 0 : i32
    return %c0_i32, %c0_i32_0 : i32, i32
  }
  func.func @transform_8(%arg0: i32) -> (i32, i32) {
    %c0_i32 = arith.constant 0 : i32
    %c0_i32_0 = arith.constant 0 : i32
    %c0_i32_1 = arith.constant 0 : i32
    return %c0_i32, %c0_i32_0 : i32, i32
  }
  func.func @transform_9(%arg0: i32) -> (i32, i32) {
    %c0_i32 = arith.constant 0 : i32
    %c0_i32_0 = arith.constant 0 : i32
    return %arg0, %c0_i32 : i32, i32
  }
}

</mosaic_0001>

<bundles_post_ra>
// kernel: tpu_custom_call.1
= control target key start
LH: loop header
LB: loop body
LE: loop exit
PB: predicated region body
PF: predicated region fallthrough
CT: control target
= control target key end

     0   :  { %s2756_s0 = inlined_call_operand.hbm [shape: f32[256,128], index: 0, kind: input, shape index: {}]   ;;  %s2757_s1 = inlined_call_operand.hbm [shape: f32[128,128], index: 1, kind: input, shape index: {}]   ;;  %s2758_s2 = inlined_call_operand.hbm [shape: f32[1,128], index: 2, kind: input, shape index: {}]   ;;  %s2759_s3 = inlined_call_operand.hbm [shape: f32[3,128,128], index: 3, kind: input, shape index: {}]   ;;  %s2760_s4 = inlined_call_operand.vmem [shape: f32[3,1,128], index: 4, kind: input, shape index: {}]   ;;  %s2761_s5 = inlined_call_operand.hbm [shape: f32[3,128,128], index: 5, kind: input, shape index: {}]   ;;  %s2762_s6 = inlined_call_operand.hbm [shape: f32[3,1,128], index: 6, kind: input, shape index: {}]   ;;  %s2763_s7 = inlined_call_operand.hbm [shape: f32[128,128], index: 7, kind: input, shape index: {}]   ;;  %s2764_s8 = inlined_call_operand.vmem [shape: f32[1,128], index: 8, kind: input, shape index: {}]   ;;  %s2765_s9 = inlined_call_operand.hbm [shape: f32[256,128], index: 9, kind: output, shape index: {}]  }
   0x1   :  { %2768 = sst [smem:[#allocation21_spill]] %s2757_s1 }
   0x2   :  { %2769 = sst [smem:[#allocation22_spill]] %s2758_s2 }
   0x3   :  { %2770 = sst [smem:[#allocation23_spill]] %s2759_s3 }
   0x4   :  { %2771 = sst [smem:[#allocation24_spill]] %s2761_s5 }
   0x5   :  { %14 = vsyncpa [#allocation4], 0 }
   0x6   :  { %16 = vsyncpa [#allocation4 + $0x1], 0 }
   0x7   :  { %17 = vsyncpa [#allocation7], 0 }
   0x8   :  { %18 = vsyncpa [#allocation10], 0 }
   0x9   :  { %19 = vsyncpa [#allocation13], 0 }
   0xa   :  { %20 = vsyncpa [#allocation5], 0 }
   0xb   :  { %22 = vsyncpa [#allocation5 + $0x1], 0  ;;  %s2093_s30 = smov 0   ;;  %s2095_s10 = smov 0  }
   0xc   :  { %s2097_s11 = smov 0   ;;  %s2099_s12 = smov 0  }
   0xd LB: > { %s2772_s1 = sld [smem:[#allocation21_spill]]  ;;  %s2117_s16 = sadd.s32 4294967295, %s2029_s12   ;;  %s2029_s12 = sphi %s2099_s12, %s2789_s12   ;;  %s2025_s11 = sphi %s2097_s11, %s2788_s11   ;;  %s2021_s10 = sphi %s2095_s10, %s2787_s10   ;;  %s2017_s30 = sphi %s2093_s30, %s2786_s30  }
   0xe   : > { %p1591_p0 = scmp.ge.s32.totalorder %s2029_s12, 1  ;;  %p49_p1 = scmp.eq.s32.totalorder %s2117_s16, 0 }
   0xf   : > { %p253_p2 = scmp.lt.s32.totalorder %s2029_s12, 3  ;;  %s2031_s18 = smov [#allocation6]  }
  0x10   : > { %s266_s19 = sshll.u32 %s2031_s18, 4  ;;  %s2774_s3 = sld [smem:[#allocation23_spill]]  ;;  %s267_s19 = int_to_ptr.vmem [resolvable:$true] %s266_s19 }
  0x11   : > { %p2122_p3 = pnand %p1591_p0, %p253_p2  ;;  %s321_s26 = sshll.u32 %s2762_s6, 4  ;;  %s322_s26 = int_to_ptr.hbm [resolvable:$true] %s321_s26 }
  0x12   : > { %s2032_s27 = smov [#allocation9]   ;;  %s2766_s29 = smov 128  }
  0x13   : > { %s264_s15 = sshll.u32 %s2772_s1, 4  ;;  %p1648_p4 = pneg %p2122_p3  ;;  %s265_s15 = int_to_ptr.hbm [resolvable:$true] %s264_s15 }
  0x14   : > { %s292_s28 = sshll.u32 %s2032_s27, 4  ;;  %s2767_s13 = smov 8   ;;  %s293_s28 = int_to_ptr.vmem [resolvable:$true] %s292_s28 }
  0x15   : > { %p2134_p6 = pnand %p1648_p4, %p49_p1  ;;  %s2035_s14 = smov [#allocation12]  }
  0x16   : > { %s290_s22 = sshll.u32 %s2774_s3, 4  ;;  %s323_s18 = sshll.u32 %s2035_s14, 4  ;;  %s291_s22 = int_to_ptr.hbm [resolvable:$true] %s290_s22  ;;  %s324_s18 = int_to_ptr.vmem [resolvable:$true] %s323_s18 }
  0x17   : > { %1651 = dma.hbm_to_vmem [thread:$0]  (!%p2134_p6), %s265_s15, 2048, %s267_s19, [#allocation7], %s2766_s29, %s2766_s29, %s2767_s13  }
  0x18   : > { %1657 = dma.hbm_to_vmem [thread:$0]  (!%p2134_p6), %s291_s22, 6144, %s293_s28, [#allocation10], %s2766_s29, %s2766_s29, %s2767_s13  }
  0x19   : > { %s2776_s2 = sld [smem:[#allocation22_spill]]  ;;  %s2036_s25 = smov 16  }
  0x1a   : > { %s2037_s27 = smov 1   ;;  %s2038_s15 = smov [#allocation8]  }
  0x1b   : > { %1663 = dma.hbm_to_vmem [thread:$0]  (!%p2134_p6), %s322_s26, 48, %s324_s18, [#allocation13], %s2036_s25, %s2036_s25, %s2037_s27  }
  0x1c   : > { %s281_s19 = sshll.u32 %s2038_s15, 4  ;;  %s2777_s5 = sld [smem:[#allocation24_spill]]  ;;  %s282_s19 = int_to_ptr.vmem [resolvable:$true] %s281_s19 }
  0x1d   : > { %s335_s26 = sshll.u32 %s2763_s7, 4  ;;  %s2039_s18 = smov [#allocation11]   ;;  %s336_s26 = int_to_ptr.hbm [resolvable:$true] %s335_s26 }
  0x1e   : > { %s309_s20 = sshll.u32 %s2039_s18, 4  ;;  %s2040_s1 = smov [#allocation14]   ;;  %s310_s20 = int_to_ptr.vmem [resolvable:$true] %s309_s20 }
  0x1f   : > { %s279_s24 = sshll.u32 %s2776_s2, 4  ;;  %s337_s3 = sshll.u32 %s2040_s1, 4  ;;  %s280_s24 = int_to_ptr.hbm [resolvable:$true] %s279_s24  ;;  %s338_s3 = int_to_ptr.vmem [resolvable:$true] %s337_s3 }
  0x20   : > { %1654 = dma.hbm_to_vmem [thread:$0]  (!%p2134_p6), %s280_s24, 16, %s282_s19, [#allocation7]  }
  0x21   : > { %1666 = dma.hbm_to_vmem [thread:$0]  (!%p2134_p6), %s336_s26, 2048, %s338_s3, [#allocation13], %s2766_s29, %s2766_s29, %s2767_s13  }
  0x22   : > { %s307_s22 = sshll.u32 %s2777_s5, 4  ;;  %s1590_s21 = sadd.s32 4294967294, %s2029_s12   ;;  %s308_s22 = int_to_ptr.hbm [resolvable:$true] %s307_s22 }
  0x23   : > { %1660 = dma.hbm_to_vmem [thread:$0]  (!%p2134_p6), %s308_s22, 6144, %s310_s20, [#allocation10], %s2766_s29, %s2766_s29, %s2767_s13  }
  0x24   : > { %s2176_s24 = sadd.s32 1, %s2029_s12   ;;  %s35_s27 = sadd.s32 1, %s2025_s11 }
  0x25   : > { %s32_s25 = ssub.s32 %s2029_s12, %s2176_s24  ;;  %p42_p8 = scmp.ne.s32.totalorder %s2025_s11, %s2021_s10 }
  0x26   : > { %p33_p7 = scmp.eq.s32.totalorder %s32_s25, 0  ;;  %p43_p9 = scmp.eq.s32.totalorder %s2029_s12, 0 }
  0x27   : > { %p48_p10 = scmp.ne.s32.totalorder %s2021_s10, %s2017_s30  ;;  %p240_p13 = scmp.eq.s32.totalorder %s2117_s16, 1 }
  0x28   : > { %s2187_s15 = scalar_select %p33_p7, %s2025_s11, %s35_s27  }
  0x29   : > { %p2189_p11 = por %p43_p9, %p42_p8  ;;  %p2195_p12 = por %p49_p1, %p48_p10 }
  0x2a   : > { %p246_p0 = scmp.eq.s32.totalorder %s1590_s21, 1  ;;  %p1681_p2 = scmp.lt.s32.totalorder %s2029_s12, 2 }
  0x2b   : > { %s354_s22 = sand.u32 1, %s2025_s11   ;;  %p2202_p4 = por %p240_p13, %p42_p8 }
  0x2c   : > { %p2206_p6 = por %p246_p0, %p48_p10  ;;  %s1599_s26 = sshll.u32 %s354_s22, 7 }
  0x2d   : > { %s1618_s18 = sshll.u32 %s2029_s12, 7  ;;  %s358_s25 = scalar_lea.vmem [#allocation3], %s1599_s26 }
  0x2e   : > { %s363_s3 = scalar_lea.hbm %s2756_s0, %s1618_s18  ;;  %s366_s27 = sshll.u32 %s358_s25, 4  ;;  %s367_s27 = int_to_ptr.vmem [resolvable:$true] %s366_s27 }
  0x2f   : > { %s364_s29 = sshll.u32 %s363_s3, 4  ;;  %p2216_p7 = pnand %p1681_p2, %p2189_p11  ;;  %s365_s29 = int_to_ptr.hbm [resolvable:$true] %s364_s29 }
  0x30   : > { %s355_s13 = scalar_lea.sflag [#allocation4], %s354_s22  ;;  %s1921_s2 = sshra.s32 %s365_s29, 4  ;;  %s1922_s2 = int_to_ptr.hbm [resolvable:$true] %s1921_s2 }
  0x31   : > { %s1923_s5 = scalar_lea.hbm %s1922_s2, 128  ;;  %p1925_p9 = pneg %p2216_p7 }
  0x32   : > { %p1924_p8 = scmp.ne.s32.totalorder %s1922_s2, %s1923_s5  ;;  %s1928_s20 = scalar_lea.hbm %s2756_s0, 256 }
  0x33   : > { %p1929_p11 = scmp.lt.s32.totalorder %s1922_s2, %s2756_s0  ;;  %p1930_p0 = scmp.lt.s32.totalorder %s1928_s20, %s1923_s5 }
  0x34   : > { %p1926_p10 = pnand %p1925_p9, %p1924_p8 }
  0x35   : > { %p1931_p2 = por %p1930_p0, %p1929_p11 }
  0x36   : > { %p1927_p13 = pneg %p1926_p10 }
  0x38   : > { %p1932_p5 = pnand %p1931_p2, %p1927_p13 }
  0x3a   : > { %1935 = shalt.err (!%p1932_p5)
}
  0x3b   : > { %s2783_s22 = smov 8   ;;  %s2784_s3 = smov 128  }
  0x3c   : > { %1670 = dma.hbm_to_vmem [thread:$0]  (!%p2216_p7), %s365_s29, 2048, %s367_s27, %s355_s13, %s2784_s3, %s2784_s3, %s2783_s22  }
  0x3d   : > { %378 = sbr.rel (%p2122_p3) target bundleno = 1295 (0x50f), region = 56  ;;  %s2236_s25 = sand.u32 (!%p2122_p3), 1, %s2021_s10  }
  0x3e   : > { %s1603_s2 = sshll.u32 (!%p2122_p3), %s2236_s25, 7  ;;  %s381_s5 = scalar_lea.sflag (!%p2122_p3), [#allocation4], %s2236_s25 }
  0x3f   : > { %s2242_s26 = scalar_lea.vmem (!%p2122_p3), [#allocation3], %s1603_s2 }
  0x42   : > { %1996 = dma.done.wait (%p2195_p12), %s381_s5, 2048  }
  0x43   : > { %1998 = vsyncadd (%p2195_p12), %s381_s5, 4294965248 }
  0x44   : > { %2000 = dma.done.wait (%p49_p1), [#allocation7], 2064  }
  0x45   : > { %2002 = vsyncadd (%p49_p1), [#allocation7], 4294965232 }
  0x46   : > { %2004 = dma.done.wait (%p49_p1), [#allocation10], 12288  }
  0x47   : > { %2006 = vsyncadd (%p49_p1), [#allocation10], 4294955008 }
  0x48   : > { %2008 = dma.done.wait (%p49_p1), [#allocation13], 2096  }
  0x49   : > { %2010 = vsyncadd (%p49_p1), [#allocation13], 4294965200  ;;  %v483_v0 = vld [vmem:[#allocation6 + $0x78] sm:$0xff]  ;;  %v482_v1 = vld [vmem:[#allocation6 + $0x70] sm:$0xff]  ;;  %s2704_s1 = scalar_lea.vmem [#allocation15], %s1603_s2  ;;  %s1619_s23 = sshll.u32 %s2117_s16, 7 }
  0x4a   : > { %488 = vmatpush.msra.mxu0 %v483_v0  ;;  %v481_v2 = vld [vmem:[#allocation6 + $0x68] sm:$0xff]  ;;  %v480_v3 = vld [vmem:[#allocation6 + $0x60] sm:$0xff]  ;;  %v479_v4 = vld [vmem:[#allocation6 + $0x58] sm:$0xff]  ;;  %s1456_s2 = scalar_lea.hbm %s2765_s9, %s1619_s23  ;;  %s1457_s5 = sshll.u32 %s2704_s1, 4  ;;  %s1458_s5 = int_to_ptr.vmem [resolvable:$true] %s1457_s5 }
  0x4b   : > { %v478_v5 = vld [vmem:[#allocation6 + $0x50] sm:$0xff]  ;;  %v477_v6 = vld [vmem:[#allocation6 + $0x48] sm:$0xff]  ;;  %v476_v7 = vld [vmem:[#allocation6 + $0x40] sm:$0xff]  ;;  %s1445_s17 = scalar_lea.sflag [#allocation5], %s2236_s25  ;;  %s1971_s27 = scalar_lea.hbm %s2765_s9, 256 }
  0x4c   : > { %489 = vmatpush.msra.mxu0 %v482_v1  ;;  %v475_v8 = vld [vmem:[#allocation6 + $0x38] sm:$0xff]  ;;  %v474_v9 = vld [vmem:[#allocation6 + $0x30] sm:$0xff]  ;;  %v473_v10 = vld [vmem:[#allocation6 + $0x28] sm:$0xff] }
  0x4d   : > { %v472_v11 = vld [vmem:[#allocation6 + $0x20] sm:$0xff]  ;;  %v471_v12 = vld [vmem:[#allocation6 + $0x18] sm:$0xff]  ;;  %v470_v13 = vld [vmem:[#allocation6 + $0x10] sm:$0xff] }
  0x4e   : > { %490 = vmatpush.msra.mxu0 %v481_v2  ;;  %v469_v14 = vld [vmem:[#allocation6 + $0x8] sm:$0xff]  ;;  %v468_v15 = vld [vmem:[#allocation6] sm:$0xff]  ;;  %v454_v18 = vld [vmem:[%s2242_s26 + $0x10] sm:$0xff] }
  0x4f   : > { %v452_v16 = vld [vmem:[%s2242_s26] sm:$0xff]  ;;  %v453_v17 = vld [vmem:[%s2242_s26 + $0x8] sm:$0xff]  ;;  %v455_v19 = vld [vmem:[%s2242_s26 + $0x18] sm:$0xff] }
  0x50   : > { %491 = vmatpush.msra.mxu0 %v480_v3  ;;  %v456_v20 = vld [vmem:[%s2242_s26 + $0x20] sm:$0xff]  ;;  %v457_v21 = vld [vmem:[%s2242_s26 + $0x28] sm:$0xff]  ;;  %v458_v22 = vld [vmem:[%s2242_s26 + $0x30] sm:$0xff] }
  0x51   : > { %v459_v23 = vld [vmem:[%s2242_s26 + $0x38] sm:$0xff]  ;;  %v460_v24 = vld [vmem:[%s2242_s26 + $0x40] sm:$0xff]  ;;  %v598_v27 = vld [vmem:[#allocation9 + $0x68] sm:$0xff] }
  0x52   : > { %492 = vmatpush.msra.mxu0 %v479_v4  ;;  %v600_v25 = vld [vmem:[#allocation9 + $0x78] sm:$0xff]  ;;  %v599_v26 = vld [vmem:[#allocation9 + $0x70] sm:$0xff]  ;;  %v597_v28 = vld [vmem:[#allocation9 + $0x60] sm:$0xff] }
  0x53   : > { %605 = vmatpush.msra.mxu1 %v600_v25  ;;  %v461_v29 = vld [vmem:[%s2242_s26 + $0x48] sm:$0xff]  ;;  %v596_v30 = vld [vmem:[#allocation9 + $0x58] sm:$0xff]  ;;  %v595_v31 = vld [vmem:[#allocation9 + $0x50] sm:$0xff] }
  0x54   : > { %493 = vmatpush.msra.mxu0 %v478_v5  ;;  %v594_v32 = vld [vmem:[#allocation9 + $0x48] sm:$0xff]  ;;  %v593_v33 = vld [vmem:[#allocation9 + $0x40] sm:$0xff]  ;;  %v592_v35 = vld [vmem:[#allocation9 + $0x38] sm:$0xff] }
  0x55   : > { %606 = vmatpush.msra.mxu1 %v599_v26  ;;  %v462_v34 = vld [vmem:[%s2242_s26 + $0x50] sm:$0xff]  ;;  %v589_v38 = vld [vmem:[#allocation9 + $0x20] sm:$0xff]  ;;  %v463_v39 = vld [vmem:[%s2242_s26 + $0x58] sm:$0xff] }
  0x56   : > { %494 = vmatpush.msra.mxu0 %v477_v6  ;;  %v591_v36 = vld [vmem:[#allocation9 + $0x30] sm:$0xff]  ;;  %v590_v37 = vld [vmem:[#allocation9 + $0x28] sm:$0xff]  ;;  %v588_v40 = vld [vmem:[#allocation9 + $0x18] sm:$0xff] }
  0x57   : > { %607 = vmatpush.msra.mxu1 %v598_v27  ;;  %v587_v41 = vld [vmem:[#allocation9 + $0x10] sm:$0xff]  ;;  %v586_v42 = vld [vmem:[#allocation9 + $0x8] sm:$0xff]  ;;  %v464_v43 = vld [vmem:[%s2242_s26 + $0x60] sm:$0xff] }
  0x58   : > { %495 = vmatpush.msra.mxu0 %v476_v7  ;;  %v585_v44 = vld [vmem:[#allocation9] sm:$0xff]  ;;  %v466_v46 = vld [vmem:[%s2242_s26 + $0x70] sm:$0xff]  ;;  %v467_v47 = vld [vmem:[%s2242_s26 + $0x78] sm:$0xff] }
  0x59   : > { %608 = vmatpush.msra.mxu1 %v597_v28  ;;  %v465_v45 = vld [vmem:[%s2242_s26 + $0x68] sm:$0xff]  ;;  %v2276_v48 = vld [vmem:[#allocation8] ss:$0 sm:$0xff]  ;;  %v700_v4 = vld [vmem:[#allocation11 + $0x70] sm:$0xff]  ;;  %s1459_s26 = sshll.u32 %s1456_s2, 4  ;;  %s1460_s26 = int_to_ptr.hbm [resolvable:$true] %s1459_s26 }
  0x5a   : > { %496 = vmatpush.msra.mxu0 %v475_v8  ;;  %v701_v3 = vld [vmem:[#allocation11 + $0x78] sm:$0xff]  ;;  %v699_v7 = vld [vmem:[#allocation11 + $0x68] sm:$0xff]  ;;  %v698_v8 = vld [vmem:[#allocation11 + $0x60] sm:$0xff]  ;;  %s1965_s29 = sshra.s32 %s1460_s26, 4  ;;  %s1966_s29 = int_to_ptr.hbm [resolvable:$true] %s1965_s29 }
  0x5b   : > { %609 = vmatpush.msra.mxu1 %v596_v30  ;;  %706 = vmatpush.msra.mxu2 %v701_v3  ;;  %v687_v25 = vld [vmem:[#allocation11 + $0x8] sm:$0xff]  ;;  %v686_v26 = vld [vmem:[#allocation11] sm:$0xff]  ;;  %s1967_s13 = scalar_lea.hbm %s1966_s29, 128  ;;  %p1972_p12 = scmp.lt.s32.totalorder %s1966_s29, %s2765_s9 }
  0x5c   : > { %497 = vmatpush.msra.mxu0 %v474_v9  ;;  %v697_v9 = vld [vmem:[#allocation11 + $0x58] sm:$0xff]  ;;  %p1968_p1 = scmp.ne.s32.totalorder %s1966_s29, %s1967_s13  ;;  %p1973_p7 = scmp.lt.s32.totalorder %s1971_s27, %s1967_s13 }
  0x5d   : > { %610 = vmatpush.msra.mxu1 %v595_v31  ;;  %707 = vmatpush.msra.mxu2 %v700_v4 }
  0x5e   : > { %498 = vmatpush.msra.mxu0 %v473_v10  ;;  %v696_v10 = vld [vmem:[#allocation11 + $0x50] sm:$0xff]  ;;  %p1969_p3 = pnand %p1968_p1, %p2202_p4  ;;  %p1974_p8 = por %p1973_p7, %p1972_p12 }
  0x5f   : > { %611 = vmatpush.msra.mxu1 %v594_v32  ;;  %708 = vmatpush.msra.mxu2 %v699_v7 }
  0x60   : > { %499 = vmatpush.msra.mxu0 %v472_v11  ;;  %p1970_p5 = pneg %p1969_p3 }
  0x61   : > { %612 = vmatpush.msra.mxu1 %v593_v33  ;;  %709 = vmatpush.msra.mxu2 %v698_v8  ;;  %v2345_v33 = vld [vmem:[%s2760_s4] ss:$0 sm:$0xff] }
  0x62   : > { %500 = vmatpush.msra.mxu0 %v471_v12  ;;  %p1975_p9 = pnand %p1974_p8, %p1970_p5 }
  0x63   : > { %613 = vmatpush.msra.mxu1 %v592_v35  ;;  %710 = vmatpush.msra.mxu2 %v697_v9 }
  0x64   : > { %501 = vmatpush.msra.mxu0 %v470_v13  ;;  %v695_v13 = vld [vmem:[#allocation11 + $0x48] sm:$0xff] }
  0x65   : > { %614 = vmatpush.msra.mxu1 %v591_v36  ;;  %711 = vmatpush.msra.mxu2 %v696_v10  ;;  %v851_v10 = vld [vmem:[#allocation9 + $0xf8] sm:$0xff] }
  0x66   : > { %502 = vmatpush.msra.mxu0 %v469_v14  ;;  %v694_v14 = vld [vmem:[#allocation11 + $0x40] sm:$0xff]  ;;  %857 = vmatpush.msra.mxu3 %v851_v10 }
  0x67   : > { %615 = vmatpush.msra.mxu1 %v590_v37  ;;  %712 = vmatpush.msra.mxu2 %v695_v13 }
  0x68   : > { %503 = vmatpush.msra.mxu0 %v468_v15  ;;  %v693_v15 = vld [vmem:[#allocation11 + $0x38] sm:$0xff] }
  0x69   : > { %504 = vmatmul.f32.vlgmr.msra.gmra.mxu0 %v452_v16  ;;  %616 = vmatpush.msra.mxu1 %v589_v38  ;;  %v692_v16 = vld [vmem:[#allocation11 + $0x30] sm:$0xff] }
  0x6a   : > { %713 = vmatpush.msra.mxu2 %v694_v14  ;;  %v850_v14 = vld [vmem:[#allocation9 + $0xf0] sm:$0xff] }
  0x6b   : > { %617 = vmatpush.msra.mxu1 %v588_v40  ;;  %858 = vmatpush.msra.mxu3 %v850_v14 }
  0x6c   : > { %714 = vmatpush.msra.mxu2 %v693_v15 }
  0x6d   : > { %618 = vmatpush.msra.mxu1 %v587_v41 }
  0x6e   : > { %715 = vmatpush.msra.mxu2 %v692_v16  ;;  %v849_v16 = vld [vmem:[#allocation9 + $0xe8] sm:$0xff] }
  0x6f   : > { %619 = vmatpush.msra.mxu1 %v586_v42  ;;  %859 = vmatpush.msra.mxu3 %v849_v16 }
  0x71   : > { %507 = vmatmul.f32.gmra.mxu0 %v453_v17  ;;  %620 = vmatpush.msra.mxu1 %v585_v44 }
  0x79   : > { %510 = vmatmul.f32.gmra.mxu0 %v454_v18 }
  0x81   : > { %513 = vmatmul.f32.gmra.mxu0 %v455_v19  ;;  %v691_v19 = vld [vmem:[#allocation11 + $0x28] sm:$0xff] }
  0x82   : > { %716 = vmatpush.msra.mxu2 %v691_v19  ;;  %v847_v19 = vld [vmem:[#allocation9 + $0xd8] sm:$0xff] }
  0x89   : > { %516 = vmatmul.f32.gmra.mxu0 %v456_v20  ;;  %v690_v20 = vld [vmem:[#allocation11 + $0x20] sm:$0xff] }
  0x8a   : > { %717 = vmatpush.msra.mxu2 %v690_v20 }
  0x91   : > { %519 = vmatmul.f32.gmra.mxu0 %v457_v21  ;;  %v689_v21 = vld [vmem:[#allocation11 + $0x18] sm:$0xff] }
  0x92   : > { %718 = vmatpush.msra.mxu2 %v689_v21 }
  0x99   : > { %522 = vmatmul.f32.gmra.mxu0 %v458_v22  ;;  %v688_v22 = vld [vmem:[#allocation11 + $0x10] sm:$0xff] }
  0x9a   : > { %719 = vmatpush.msra.mxu2 %v688_v22  ;;  %v846_v22 = vld [vmem:[#allocation9 + $0xd0] sm:$0xff] }
  0x9c   : > { %720 = vmatpush.msra.mxu2 %v687_v25  ;;  %v845_v25 = vld [vmem:[#allocation9 + $0xc8] sm:$0xff] }
  0x9e   : > { %721 = vmatpush.msra.mxu2 %v686_v26  ;;  %v844_v26 = vld [vmem:[#allocation9 + $0xc0] sm:$0xff] }
  0xa1   : > { %525 = vmatmul.f32.gmra.mxu0 %v459_v23 }
  0xa9   : > { %528 = vmatmul.f32.gmra.mxu0 %v460_v24 }
  0xb1   : > { %531 = vmatmul.f32.gmra.mxu0 %v461_v29 }
  0xb9   : > { %534 = vmatmul.f32.gmra.mxu0 %v462_v34 }
  0xc1   : > { %537 = vmatmul.f32.gmra.mxu0 %v463_v39 }
  0xc9   : > { %540 = vmatmul.f32.gmra.mxu0 %v464_v43 }
  0xd1   : > { %543 = vmatmul.f32.gmra.mxu0 %v465_v45 }
  0xd9   : > { %546 = vmatmul.f32.gmra.mxu0 %v466_v46 }
  0xe1   : > { %549 = vmatmul.f32.gmra.mxu0 %v467_v47 }
  0xe6   : > { %v505_v49 = vpop.f32.mrf.mxu0 }
  0xe7   : > { %v2279_v50 = vadd.f32 %v2276_v48, %v505_v49 }
  0xe9   : > { %621 = vmatmul.f32.vlgmr.msra.gmra.mxu1 %v2279_v50 }
  0xee   : > { %v508_v51 = vpop.f32.mrf.mxu0 }
  0xef   : > { %v2283_v52 = vadd.f32 %v2276_v48, %v508_v51 }
  0xf1   : > { %624 = vmatmul.f32.gmra.mxu1 %v2283_v52 }
  0xf6   : > { %v511_v53 = vpop.f32.mrf.mxu0 }
  0xf7   : > { %v2287_v54 = vadd.f32 %v2276_v48, %v511_v53 }
  0xf9   : > { %627 = vmatmul.f32.gmra.mxu1 %v2287_v54 }
  0xfe   : > { %v514_v55 = vpop.f32.mrf.mxu0 }
  0xff   : > { %v2291_v56 = vadd.f32 %v2276_v48, %v514_v55 }
 0x101   : > { %630 = vmatmul.f32.gmra.mxu1 %v2291_v56 }
 0x106   : > { %v517_v57 = vpop.f32.mrf.mxu0 }
 0x107   : > { %v2295_v58 = vadd.f32 %v2276_v48, %v517_v57 }
 0x109   : > { %633 = vmatmul.f32.gmra.mxu1 %v2295_v58 }
 0x10e   : > { %v520_v59 = vpop.f32.mrf.mxu0 }
 0x10f   : > { %v2299_v60 = vadd.f32 %v2276_v48, %v520_v59 }
 0x111   : > { %636 = vmatmul.f32.gmra.mxu1 %v2299_v60 }
 0x116   : > { %v523_v61 = vpop.f32.mrf.mxu0 }
 0x117   : > { %v2303_v62 = vadd.f32 %v2276_v48, %v523_v61 }
 0x119   : > { %639 = vmatmul.f32.gmra.mxu1 %v2303_v62 }
 0x11e   : > { %v526_v63 = vpop.f32.mrf.mxu0 }
 0x11f   : > { %v2307_v0 = vadd.f32 %v2276_v48, %v526_v63 }
 0x121   : > { %642 = vmatmul.f32.gmra.mxu1 %v2307_v0 }
 0x126   : > { %v529_v1 = vpop.f32.mrf.mxu0 }
 0x127   : > { %v2311_v2 = vadd.f32 %v2276_v48, %v529_v1 }
 0x129   : > { %645 = vmatmul.f32.gmra.mxu1 %v2311_v2 }
 0x12e   : > { %v532_v5 = vpop.f32.mrf.mxu0 }
 0x12f   : > { %v2315_v6 = vadd.f32 %v2276_v48, %v532_v5 }
 0x131   : > { %648 = vmatmul.f32.gmra.mxu1 %v2315_v6 }
 0x136   : > { %v535_v11 = vpop.f32.mrf.mxu0 }
 0x137   : > { %v2319_v12 = vadd.f32 %v2276_v48, %v535_v11 }
 0x139   : > { %651 = vmatmul.f32.gmra.mxu1 %v2319_v12 }
 0x13e   : > { %v538_v17 = vpop.f32.mrf.mxu0 }
 0x13f   : > { %v2323_v18 = vadd.f32 %v2276_v48, %v538_v17  ;;  %v848_v17 = vld [vmem:[#allocation9 + $0xe0] sm:$0xff] }
 0x140   : > { %860 = vmatpush.msra.mxu3 %v848_v17 }
 0x141   : > { %654 = vmatmul.f32.gmra.mxu1 %v2323_v18 }
 0x142   : > { %861 = vmatpush.msra.mxu3 %v847_v19 }
 0x144   : > { %862 = vmatpush.msra.mxu3 %v846_v22 }
 0x146   : > { %v541_v23 = vpop.f32.mrf.mxu0  ;;  %863 = vmatpush.msra.mxu3 %v845_v25 }
 0x147   : > { %v2327_v24 = vadd.f32 %v2276_v48, %v541_v23 }
 0x148   : > { %864 = vmatpush.msra.mxu3 %v844_v26 }
 0x149   : > { %657 = vmatmul.f32.gmra.mxu1 %v2327_v24 }
 0x14e   : > { %v544_v27 = vpop.f32.mrf.mxu0 }
 0x14f   : > { %v2331_v28 = vadd.f32 %v2276_v48, %v544_v27  ;;  %v843_v27 = vld [vmem:[#allocation9 + $0xb8] sm:$0xff] }
 0x150   : > { %865 = vmatpush.msra.mxu3 %v843_v27 }
 0x151   : > { %660 = vmatmul.f32.gmra.mxu1 %v2331_v28 }
 0x156   : > { %v547_v29 = vpop.f32.mrf.mxu0 }
 0x157   : > { %v2335_v30 = vadd.f32 %v2276_v48, %v547_v29  ;;  %v842_v29 = vld [vmem:[#allocation9 + $0xb0] sm:$0xff] }
 0x158   : > { %866 = vmatpush.msra.mxu3 %v842_v29 }
 0x159   : > { %663 = vmatmul.f32.gmra.mxu1 %v2335_v30 }
 0x15e   : > { %v550_v31 = vpop.f32.mrf.mxu0 }
 0x15f   : > { %v2339_v32 = vadd.f32 %v2276_v48, %v550_v31 }
 0x161   : > { %666 = vmatmul.f32.gmra.mxu1 %v2339_v32 }
 0x166   : > { %v622_v34 = vpop.f32.mrf.mxu1 }
 0x167   : > { %v623_v35 = vadd.f32 %v2345_v33, %v622_v34 }
 0x169   : > { %v670_v36 = vmax.f32 %v623_v35, 0.0  ;;  %v841_v35 = vld [vmem:[#allocation9 + $0xa8] sm:$0xff] }
 0x16a   : > { %867 = vmatpush.msra.mxu3 %v841_v35 }
 0x16b   : > { %722 = vmatmul.f32.vlgmr.msra.gmra.mxu2 %v670_v36 }
 0x16e   : > { %v625_v37 = vpop.f32.mrf.mxu1 }
 0x16f   : > { %v626_v38 = vadd.f32 %v2345_v33, %v625_v37  ;;  %v840_v37 = vld [vmem:[#allocation9 + $0xa0] sm:$0xff] }
 0x170   : > { %868 = vmatpush.msra.mxu3 %v840_v37 }
 0x171   : > { %v671_v39 = vmax.f32 %v626_v38, 0.0  ;;  %v839_v38 = vld [vmem:[#allocation9 + $0x98] sm:$0xff] }
 0x172   : > { %869 = vmatpush.msra.mxu3 %v839_v38 }
 0x173   : > { %725 = vmatmul.f32.gmra.mxu2 %v671_v39 }
 0x176   : > { %v628_v40 = vpop.f32.mrf.mxu1 }
 0x177   : > { %v629_v41 = vadd.f32 %v2345_v33, %v628_v40 }
 0x179   : > { %v672_v42 = vmax.f32 %v629_v41, 0.0  ;;  %v838_v41 = vld [vmem:[#allocation9 + $0x90] sm:$0xff] }
 0x17a   : > { %870 = vmatpush.msra.mxu3 %v838_v41 }
 0x17b   : > { %728 = vmatmul.f32.gmra.mxu2 %v672_v42  ;;  %v837_v42 = vld [vmem:[#allocation9 + $0x88] sm:$0xff] }
 0x17c   : > { %871 = vmatpush.msra.mxu3 %v837_v42 }
 0x17e   : > { %v631_v43 = vpop.f32.mrf.mxu1 }
 0x17f   : > { %v632_v44 = vadd.f32 %v2345_v33, %v631_v43 }
 0x181   : > { %v673_v45 = vmax.f32 %v632_v44, 0.0  ;;  %v836_v44 = vld [vmem:[#allocation9 + $0x80] sm:$0xff] }
 0x182   : > { %872 = vmatpush.msra.mxu3 %v836_v44 }
 0x183   : > { %731 = vmatmul.f32.gmra.mxu2 %v673_v45 }
 0x186   : > { %v634_v46 = vpop.f32.mrf.mxu1 }
 0x187   : > { %v635_v47 = vadd.f32 %v2345_v33, %v634_v46 }
 0x189   : > { %v674_v48 = vmax.f32 %v635_v47, 0.0 }
 0x18b   : > { %734 = vmatmul.f32.gmra.mxu2 %v674_v48  ;;  %v954_v48 = vld [vmem:[#allocation11 + $0xf8] sm:$0xff] }
 0x18c   : > { %960 = vmatpush.msrb.mxu0 %v954_v48 }
 0x18e   : > { %v637_v49 = vpop.f32.mrf.mxu1 }
 0x18f   : > { %v638_v51 = vadd.f32 %v2345_v33, %v637_v49 }
 0x191   : > { %v675_v53 = vmax.f32 %v638_v51, 0.0 }
 0x193   : > { %737 = vmatmul.f32.gmra.mxu2 %v675_v53 }
 0x196   : > { %v640_v55 = vpop.f32.mrf.mxu1 }
 0x197   : > { %v641_v57 = vadd.f32 %v2345_v33, %v640_v55  ;;  %v953_v55 = vld [vmem:[#allocation11 + $0xf0] sm:$0xff] }
 0x198   : > { %961 = vmatpush.msrb.mxu0 %v953_v55 }
 0x199   : > { %v676_v59 = vmax.f32 %v641_v57, 0.0  ;;  %v2363_v57 = vld [vmem:[#allocation12] ss:$0 sm:$0xff] }
 0x19b   : > { %740 = vmatmul.f32.gmra.mxu2 %v676_v59  ;;  %v952_v59 = vld [vmem:[#allocation11 + $0xe8] sm:$0xff] }
 0x19c   : > { %962 = vmatpush.msrb.mxu0 %v952_v59 }
 0x19e   : > { %v643_v61 = vpop.f32.mrf.mxu1 }
 0x19f   : > { %v644_v63 = vadd.f32 %v2345_v33, %v643_v61 }
 0x1a1   : > { %v677_v1 = vmax.f32 %v644_v63, 0.0 }
 0x1a3   : > { %743 = vmatmul.f32.gmra.mxu2 %v677_v1 }
 0x1a6   : > { %v646_v3 = vpop.f32.mrf.mxu1 }
 0x1a7   : > { %v647_v4 = vadd.f32 %v2345_v33, %v646_v3 }
 0x1a9   : > { %v678_v5 = vmax.f32 %v647_v4, 0.0 }
 0x1ab   : > { %746 = vmatmul.f32.gmra.mxu2 %v678_v5 }
 0x1ae   : > { %v649_v7 = vpop.f32.mrf.mxu1 }
 0x1af   : > { %v650_v8 = vadd.f32 %v2345_v33, %v649_v7 }
 0x1b1   : > { %v679_v9 = vmax.f32 %v650_v8, 0.0 }
 0x1b3   : > { %749 = vmatmul.f32.gmra.mxu2 %v679_v9 }
 0x1b6   : > { %v652_v11 = vpop.f32.mrf.mxu1 }
 0x1b7   : > { %v653_v13 = vadd.f32 %v2345_v33, %v652_v11 }
 0x1b9   : > { %v680_v15 = vmax.f32 %v653_v13, 0.0 }
 0x1bb   : > { %752 = vmatmul.f32.gmra.mxu2 %v680_v15 }
 0x1be   : > { %v655_v20 = vpop.f32.mrf.mxu1 }
 0x1bf   : > { %v656_v21 = vadd.f32 %v2345_v33, %v655_v20 }
 0x1c1   : > { %v681_v23 = vmax.f32 %v656_v21, 0.0 }
 0x1c3   : > { %755 = vmatmul.f32.gmra.mxu2 %v681_v23 }
 0x1c6   : > { %v658_v31 = vpop.f32.mrf.mxu1 }
 0x1c7   : > { %v659_v34 = vadd.f32 %v2345_v33, %v658_v31 }
 0x1c9   : > { %v682_v36 = vmax.f32 %v659_v34, 0.0 }
 0x1cb   : > { %758 = vmatmul.f32.gmra.mxu2 %v682_v36 }
 0x1ce   : > { %v661_v39 = vpop.f32.mrf.mxu1 }
 0x1cf   : > { %v662_v40 = vadd.f32 %v2345_v33, %v661_v39 }
 0x1d1   : > { %v683_v43 = vmax.f32 %v662_v40, 0.0 }
 0x1d3   : > { %761 = vmatmul.f32.gmra.mxu2 %v683_v43 }
 0x1d6   : > { %v664_v45 = vpop.f32.mrf.mxu1 }
 0x1d7   : > { %v665_v46 = vadd.f32 %v2345_v33, %v664_v45 }
 0x1d9   : > { %v684_v47 = vmax.f32 %v665_v46, 0.0 }
 0x1db   : > { %764 = vmatmul.f32.gmra.mxu2 %v684_v47 }
 0x1de   : > { %v667_v49 = vpop.f32.mrf.mxu1 }
 0x1df   : > { %v668_v51 = vadd.f32 %v2345_v33, %v667_v49  ;;  %v951_v33 = vld [vmem:[#allocation11 + $0xe0] sm:$0xff] }
 0x1e0   : > { %963 = vmatpush.msrb.mxu0 %v951_v33  ;;  %v939_v33 = vld [vmem:[#allocation11 + $0x80] sm:$0xff] }
 0x1e1   : > { %v685_v53 = vmax.f32 %v668_v51, 0.0 }
 0x1e3   : > { %767 = vmatmul.f32.gmra.mxu2 %v685_v53 }
 0x1ee   : > { %v723_v61 = vpop.f32.mrf.mxu2 }
 0x1ef   : > { %v724_v63 = vadd.f32 %v2363_v57, %v723_v61 }
 0x1f1   : > { %v2367_v1 = vadd.f32 %v724_v63, %v2279_v50  ;;  %v950_v50 = vld [vmem:[#allocation11 + $0xd8] sm:$0xff] }
 0x1f2   : > { %964 = vmatpush.msrb.mxu0 %v950_v50 }
 0x1f3   : > { %v787_v3 = vmax.f32 %v2367_v1, 0.0 }
 0x1f5   : > { %873 = vmatmul.f32.vlgmr.msra.gmra.mxu3 %v787_v3 }
 0x1f6   : > { %v726_v4 = vpop.f32.mrf.mxu2 }
 0x1f7   : > { %v727_v5 = vadd.f32 %v2363_v57, %v726_v4 }
 0x1f9   : > { %v2374_v7 = vadd.f32 %v727_v5, %v2283_v52  ;;  %v949_v52 = vld [vmem:[#allocation11 + $0xd0] sm:$0xff] }
 0x1fa   : > { %965 = vmatpush.msrb.mxu0 %v949_v52 }
 0x1fb   : > { %v788_v8 = vmax.f32 %v2374_v7, 0.0 }
 0x1fd   : > { %876 = vmatmul.f32.gmra.mxu3 %v788_v8 }
 0x1fe   : > { %v729_v9 = vpop.f32.mrf.mxu2 }
 0x1ff   : > { %v730_v10 = vadd.f32 %v2363_v57, %v729_v9 }
 0x201   : > { %v2381_v11 = vadd.f32 %v730_v10, %v2287_v54  ;;  %v948_v54 = vld [vmem:[#allocation11 + $0xc8] sm:$0xff] }
 0x202   : > { %966 = vmatpush.msrb.mxu0 %v948_v54 }
 0x203   : > { %v789_v13 = vmax.f32 %v2381_v11, 0.0 }
 0x205   : > { %879 = vmatmul.f32.gmra.mxu3 %v789_v13 }
 0x206   : > { %v732_v14 = vpop.f32.mrf.mxu2 }
 0x207   : > { %v733_v15 = vadd.f32 %v2363_v57, %v732_v14 }
 0x209   : > { %v2388_v16 = vadd.f32 %v733_v15, %v2291_v56  ;;  %v947_v56 = vld [vmem:[#allocation11 + $0xc0] sm:$0xff] }
 0x20a   : > { %967 = vmatpush.msrb.mxu0 %v947_v56 }
 0x20b   : > { %v790_v17 = vmax.f32 %v2388_v16, 0.0 }
 0x20d   : > { %882 = vmatmul.f32.gmra.mxu3 %v790_v17 }
 0x20e   : > { %v735_v19 = vpop.f32.mrf.mxu2 }
 0x20f   : > { %v736_v20 = vadd.f32 %v2363_v57, %v735_v19  ;;  %v1105_v19 = vld [vmem:[#allocation9 + $0x178] sm:$0xff] }
 0x210   : > { %1111 = vmatpush.msrb.mxu1 %v1105_v19 }
 0x211   : > { %v2395_v21 = vadd.f32 %v736_v20, %v2295_v58  ;;  %v946_v58 = vld [vmem:[#allocation11 + $0xb8] sm:$0xff] }
 0x212   : > { %968 = vmatpush.msrb.mxu0 %v946_v58 }
 0x213   : > { %v791_v22 = vmax.f32 %v2395_v21, 0.0 }
 0x215   : > { %885 = vmatmul.f32.gmra.mxu3 %v791_v22 }
 0x216   : > { %v738_v23 = vpop.f32.mrf.mxu2 }
 0x217   : > { %v739_v25 = vadd.f32 %v2363_v57, %v738_v23 }
 0x219   : > { %v2402_v26 = vadd.f32 %v739_v25, %v2299_v60  ;;  %v945_v60 = vld [vmem:[#allocation11 + $0xb0] sm:$0xff] }
 0x21a   : > { %969 = vmatpush.msrb.mxu0 %v945_v60  ;;  %v1104_v25 = vld [vmem:[#allocation9 + $0x170] sm:$0xff]  ;;  %v1102_v60 = vld [vmem:[#allocation9 + $0x160] sm:$0xff] }
 0x21b   : > { %v792_v27 = vmax.f32 %v2402_v26, 0.0  ;;  %1112 = vmatpush.msrb.mxu1 %v1104_v25 }
 0x21d   : > { %888 = vmatmul.f32.gmra.mxu3 %v792_v27 }
 0x21e   : > { %v741_v29 = vpop.f32.mrf.mxu2 }
 0x21f   : > { %v742_v31 = vadd.f32 %v2363_v57, %v741_v29  ;;  %v2480_v29 = vld [vmem:[%s2760_s4 + $0x1] ss:$0 sm:$0xff] }
 0x221   : > { %v2409_v34 = vadd.f32 %v742_v31, %v2303_v62  ;;  %v944_v62 = vld [vmem:[#allocation11 + $0xa8] sm:$0xff] }
 0x222   : > { %970 = vmatpush.msrb.mxu0 %v944_v62  ;;  %v1101_v62 = vld [vmem:[#allocation9 + $0x158] sm:$0xff] }
 0x223   : > { %v793_v35 = vmax.f32 %v2409_v34, 0.0 }
 0x225   : > { %891 = vmatmul.f32.gmra.mxu3 %v793_v35 }
 0x226   : > { %v744_v36 = vpop.f32.mrf.mxu2 }
 0x227   : > { %v745_v37 = vadd.f32 %v2363_v57, %v744_v36 }
 0x229   : > { %v2416_v38 = vadd.f32 %v745_v37, %v2307_v0  ;;  %v943_v0 = vld [vmem:[#allocation11 + $0xa0] sm:$0xff] }
 0x22a   : > { %971 = vmatpush.msrb.mxu0 %v943_v0 }
 0x22b   : > { %v794_v39 = vmax.f32 %v2416_v38, 0.0 }
 0x22d   : > { %894 = vmatmul.f32.gmra.mxu3 %v794_v39 }
 0x22e   : > { %v747_v40 = vpop.f32.mrf.mxu2 }
 0x22f   : > { %v748_v41 = vadd.f32 %v2363_v57, %v747_v40 }
 0x231   : > { %v2423_v42 = vadd.f32 %v748_v41, %v2311_v2  ;;  %v942_v2 = vld [vmem:[#allocation11 + $0x98] sm:$0xff] }
 0x232   : > { %972 = vmatpush.msrb.mxu0 %v942_v2 }
 0x233   : > { %v795_v43 = vmax.f32 %v2423_v42, 0.0 }
 0x235   : > { %897 = vmatmul.f32.gmra.mxu3 %v795_v43 }
 0x236   : > { %v750_v44 = vpop.f32.mrf.mxu2 }
 0x237   : > { %v751_v45 = vadd.f32 %v2363_v57, %v750_v44  ;;  %v1100_v44 = vld [vmem:[#allocation9 + $0x150] sm:$0xff] }
 0x239   : > { %v2430_v46 = vadd.f32 %v751_v45, %v2315_v6  ;;  %v941_v6 = vld [vmem:[#allocation11 + $0x90] sm:$0xff] }
 0x23a   : > { %973 = vmatpush.msrb.mxu0 %v941_v6 }
 0x23b   : > { %v796_v47 = vmax.f32 %v2430_v46, 0.0 }
 0x23d   : > { %900 = vmatmul.f32.gmra.mxu3 %v796_v47 }
 0x23e   : > { %v753_v48 = vpop.f32.mrf.mxu2 }
 0x23f   : > { %v754_v49 = vadd.f32 %v2363_v57, %v753_v48 }
 0x241   : > { %v2437_v51 = vadd.f32 %v754_v49, %v2319_v12  ;;  %v940_v12 = vld [vmem:[#allocation11 + $0x88] sm:$0xff] }
 0x242   : > { %974 = vmatpush.msrb.mxu0 %v940_v12  ;;  %v1099_v49 = vld [vmem:[#allocation9 + $0x148] sm:$0xff] }
 0x243   : > { %v797_v53 = vmax.f32 %v2437_v51, 0.0  ;;  %v1193_v51 = vld [vmem:[#allocation11 + $0x100] sm:$0xff] }
 0x244   : > { %975 = vmatpush.msrb.mxu0 %v939_v33  ;;  %v1098_v33 = vld [vmem:[#allocation9 + $0x140] sm:$0xff] }
 0x245   : > { %903 = vmatmul.f32.gmra.mxu3 %v797_v53 }
 0x246   : > { %v756_v55 = vpop.f32.mrf.mxu2 }
 0x247   : > { %v757_v59 = vadd.f32 %v2363_v57, %v756_v55 }
 0x249   : > { %v2444_v61 = vadd.f32 %v757_v59, %v2323_v18 }
 0x24b   : > { %v798_v63 = vmax.f32 %v2444_v61, 0.0 }
 0x24d   : > { %906 = vmatmul.f32.gmra.mxu3 %v798_v63 }
 0x24e   : > { %v759_v4 = vpop.f32.mrf.mxu2 }
 0x24f   : > { %v760_v5 = vadd.f32 %v2363_v57, %v759_v4 }
 0x251   : > { %v2451_v50 = vadd.f32 %v760_v5, %v2327_v24 }
 0x253   : > { %v799_v9 = vmax.f32 %v2451_v50, 0.0 }
 0x255   : > { %909 = vmatmul.f32.gmra.mxu3 %v799_v9 }
 0x256   : > { %v762_v18 = vpop.f32.mrf.mxu2 }
 0x257   : > { %v763_v10 = vadd.f32 %v2363_v57, %v762_v18 }
 0x259   : > { %v2458_v52 = vadd.f32 %v763_v10, %v2331_v28  ;;  %v1097_v10 = vld [vmem:[#allocation9 + $0x138] sm:$0xff] }
 0x25b   : > { %v800_v14 = vmax.f32 %v2458_v52, 0.0 }
 0x25d   : > { %912 = vmatmul.f32.gmra.mxu3 %v800_v14 }
 0x25e   : > { %v765_v15 = vpop.f32.mrf.mxu2 }
 0x25f   : > { %v766_v24 = vadd.f32 %v2363_v57, %v765_v15 }
 0x261   : > { %v2465_v54 = vadd.f32 %v766_v24, %v2335_v30  ;;  %v1103_v30 = vld [vmem:[#allocation9 + $0x168] sm:$0xff] }
 0x262   : > { %1113 = vmatpush.msrb.mxu1 %v1103_v30 }
 0x263   : > { %v801_v20 = vmax.f32 %v2465_v54, 0.0  ;;  %v2631_v54 = vld [vmem:[%s2760_s4 + $0x2] ss:$0 sm:$0xff] }
 0x264   : > { %1114 = vmatpush.msrb.mxu1 %v1102_v60 }
 0x265   : > { %915 = vmatmul.f32.gmra.mxu3 %v801_v20 }
 0x266   : > { %v768_v28 = vpop.f32.mrf.mxu2  ;;  %1115 = vmatpush.msrb.mxu1 %v1101_v62 }
 0x267   : > { %v769_v56 = vadd.f32 %v2363_v57, %v768_v28  ;;  %v1096_v28 = vld [vmem:[#allocation9 + $0x130] sm:$0xff] }
 0x268   : > { %1116 = vmatpush.msrb.mxu1 %v1100_v44 }
 0x269   : > { %v2472_v23 = vadd.f32 %v769_v56, %v2339_v32 }
 0x26a   : > { %1117 = vmatpush.msrb.mxu1 %v1099_v49 }
 0x26b   : > { %v802_v58 = vmax.f32 %v2472_v23, 0.0  ;;  %v1355_v23 = vld [vmem:[#allocation14 + $0x60] sm:$0xff] }
 0x26c   : > { %1118 = vmatpush.msrb.mxu1 %v1098_v33 }
 0x26d   : > { %918 = vmatmul.f32.gmra.mxu3 %v802_v58 }
 0x26e   : > { %1119 = vmatpush.msrb.mxu1 %v1097_v10 }
 0x270   : > { %1120 = vmatpush.msrb.mxu1 %v1096_v28 }
 0x278   : > { %v874_v31 = vpop.f32.mrf.mxu3 }
 0x279   : > { %v875_v57 = vadd.f32 %v2480_v29, %v874_v31  ;;  %v1095_v31 = vld [vmem:[#allocation9 + $0x128] sm:$0xff] }
 0x27a   : > { %1121 = vmatpush.msrb.mxu1 %v1095_v31 }
 0x27b   : > { %v922_v32 = vmax.f32 %v875_v57, 0.0 }
 0x27d   : > { %976 = vmatmul.f32.vlgmr.msrb.gmra.mxu0 %v922_v32 }
 0x280   : > { %v877_v36 = vpop.f32.mrf.mxu3 }
 0x281   : > { %v878_v37 = vadd.f32 %v2480_v29, %v877_v36  ;;  %v1094_v36 = vld [vmem:[#allocation9 + $0x120] sm:$0xff] }
 0x282   : > { %1122 = vmatpush.msrb.mxu1 %v1094_v36 }
 0x283   : > { %v923_v40 = vmax.f32 %v878_v37, 0.0 }
 0x285   : > { %979 = vmatmul.f32.gmra.mxu0 %v923_v40 }
 0x288   : > { %v880_v41 = vpop.f32.mrf.mxu3 }
 0x289   : > { %v881_v0 = vadd.f32 %v2480_v29, %v880_v41  ;;  %v1093_v41 = vld [vmem:[#allocation9 + $0x118] sm:$0xff] }
 0x28a   : > { %1123 = vmatpush.msrb.mxu1 %v1093_v41 }
 0x28b   : > { %v924_v45 = vmax.f32 %v881_v0, 0.0 }
 0x28d   : > { %982 = vmatmul.f32.gmra.mxu0 %v924_v45 }
 0x290   : > { %v883_v2 = vpop.f32.mrf.mxu3 }
 0x291   : > { %v884_v48 = vadd.f32 %v2480_v29, %v883_v2  ;;  %v1092_v2 = vld [vmem:[#allocation9 + $0x110] sm:$0xff] }
 0x292   : > { %1124 = vmatpush.msrb.mxu1 %v1092_v2  ;;  %v1203_v2 = vld [vmem:[#allocation11 + $0x150] sm:$0xff] }
 0x293   : > { %v925_v6 = vmax.f32 %v884_v48, 0.0 }
 0x295   : > { %985 = vmatmul.f32.gmra.mxu0 %v925_v6 }
 0x298   : > { %v886_v55 = vpop.f32.mrf.mxu3 }
 0x299   : > { %v887_v59 = vadd.f32 %v2480_v29, %v886_v55  ;;  %v1091_v55 = vld [vmem:[#allocation9 + $0x108] sm:$0xff] }
 0x29a   : > { %1125 = vmatpush.msrb.mxu1 %v1091_v55 }
 0x29b   : > { %v926_v12 = vmax.f32 %v887_v59, 0.0  ;;  %v1090_v59 = vld [vmem:[#allocation9 + $0x100] sm:$0xff] }
 0x29c   : > { %1126 = vmatpush.msrb.mxu1 %v1090_v59 }
 0x29d   : > { %988 = vmatmul.f32.gmra.mxu0 %v926_v12 }
 0x2a0   : > { %v889_v4 = vpop.f32.mrf.mxu3 }
 0x2a1   : > { %v890_v5 = vadd.f32 %v2480_v29, %v889_v4 }
 0x2a3   : > { %v927_v18 = vmax.f32 %v890_v5, 0.0 }
 0x2a5   : > { %991 = vmatmul.f32.gmra.mxu0 %v927_v18 }
 0x2a8   : > { %v892_v15 = vpop.f32.mrf.mxu3 }
 0x2a9   : > { %v893_v24 = vadd.f32 %v2480_v29, %v892_v15  ;;  %v1208_v15 = vld [vmem:[#allocation11 + $0x178] sm:$0xff] }
 0x2aa   : > { %1214 = vmatpush.msrb.mxu2 %v1208_v15 }
 0x2ab   : > { %v928_v19 = vmax.f32 %v893_v24, 0.0 }
 0x2ad   : > { %994 = vmatmul.f32.gmra.mxu0 %v928_v19 }
 0x2b0   : > { %v895_v56 = vpop.f32.mrf.mxu3 }
 0x2b1   : > { %v896_v25 = vadd.f32 %v2480_v29, %v895_v56  ;;  %v1207_v56 = vld [vmem:[#allocation11 + $0x170] sm:$0xff] }
 0x2b2   : > { %1215 = vmatpush.msrb.mxu2 %v1207_v56 }
 0x2b3   : > { %v929_v30 = vmax.f32 %v896_v25, 0.0 }
 0x2b5   : > { %997 = vmatmul.f32.gmra.mxu0 %v929_v30 }
 0x2b8   : > { %v898_v57 = vpop.f32.mrf.mxu3 }
 0x2b9   : > { %v899_v60 = vadd.f32 %v2480_v29, %v898_v57  ;;  %v1206_v57 = vld [vmem:[#allocation11 + $0x168] sm:$0xff] }
 0x2ba   : > { %1216 = vmatpush.msrb.mxu2 %v1206_v57  ;;  %v1197_v57 = vld [vmem:[#allocation11 + $0x120] sm:$0xff] }
 0x2bb   : > { %v930_v32 = vmax.f32 %v899_v60, 0.0  ;;  %v2498_v60 = vld [vmem:[#allocation12 + $0x1] ss:$0 sm:$0xff] }
 0x2bd   : > { %1000 = vmatmul.f32.gmra.mxu0 %v930_v32 }
 0x2c0   : > { %v901_v37 = vpop.f32.mrf.mxu3 }
 0x2c1   : > { %v902_v62 = vadd.f32 %v2480_v29, %v901_v37  ;;  %v1205_v37 = vld [vmem:[#allocation11 + $0x160] sm:$0xff] }
 0x2c2   : > { %1217 = vmatpush.msrb.mxu2 %v1205_v37  ;;  %v1196_v37 = vld [vmem:[#allocation11 + $0x118] sm:$0xff] }
 0x2c3   : > { %v931_v40 = vmax.f32 %v902_v62, 0.0 }
 0x2c5   : > { %1003 = vmatmul.f32.gmra.mxu0 %v931_v40 }
 0x2c8   : > { %v904_v0 = vpop.f32.mrf.mxu3 }
 0x2c9   : > { %v905_v44 = vadd.f32 %v2480_v29, %v904_v0  ;;  %v1204_v0 = vld [vmem:[#allocation11 + $0x158] sm:$0xff] }
 0x2ca   : > { %1218 = vmatpush.msrb.mxu2 %v1204_v0  ;;  %v1195_v0 = vld [vmem:[#allocation11 + $0x110] sm:$0xff] }
 0x2cb   : > { %v932_v45 = vmax.f32 %v905_v44, 0.0 }
 0x2cc   : > { %1219 = vmatpush.msrb.mxu2 %v1203_v2  ;;  %v1194_v2 = vld [vmem:[#allocation11 + $0x108] sm:$0xff] }
 0x2cd   : > { %1006 = vmatmul.f32.gmra.mxu0 %v932_v45 }
 0x2d0   : > { %v907_v48 = vpop.f32.mrf.mxu3 }
 0x2d1   : > { %v908_v49 = vadd.f32 %v2480_v29, %v907_v48 }
 0x2d3   : > { %v933_v6 = vmax.f32 %v908_v49, 0.0 }
 0x2d5   : > { %1009 = vmatmul.f32.gmra.mxu0 %v933_v6  ;;  %v1202_v6 = vld [vmem:[#allocation11 + $0x148] sm:$0xff] }
 0x2d6   : > { %1220 = vmatpush.msrb.mxu2 %v1202_v6 }
 0x2d8   : > { %v910_v12 = vpop.f32.mrf.mxu3 }
 0x2d9   : > { %v911_v33 = vadd.f32 %v2480_v29, %v910_v12 }
 0x2db   : > { %v934_v4 = vmax.f32 %v911_v33, 0.0 }
 0x2dd   : > { %1012 = vmatmul.f32.gmra.mxu0 %v934_v4  ;;  %v1201_v4 = vld [vmem:[#allocation11 + $0x140] sm:$0xff] }
 0x2de   : > { %1221 = vmatpush.msrb.mxu2 %v1201_v4  ;;  %v1358_v4 = vld [vmem:[#allocation14 + $0x78] sm:$0xff] }
 0x2df   : > { %1363 = vmatpush.msrb.mxu3 %v1358_v4 }
 0x2e0   : > { %v913_v5 = vpop.f32.mrf.mxu3 }
 0x2e1   : > { %v914_v18 = vadd.f32 %v2480_v29, %v913_v5 }
 0x2e3   : > { %v935_v10 = vmax.f32 %v914_v18, 0.0 }
 0x2e5   : > { %1015 = vmatmul.f32.gmra.mxu0 %v935_v10  ;;  %v1200_v10 = vld [vmem:[#allocation11 + $0x138] sm:$0xff] }
 0x2e6   : > { %1222 = vmatpush.msrb.mxu2 %v1200_v10  ;;  %v1357_v10 = vld [vmem:[#allocation14 + $0x70] sm:$0xff] }
 0x2e7   : > { %1364 = vmatpush.msrb.mxu3 %v1357_v10 }
 0x2e8   : > { %v916_v24 = vpop.f32.mrf.mxu3 }
 0x2e9   : > { %v917_v19 = vadd.f32 %v2480_v29, %v916_v24 }
 0x2eb   : > { %v936_v28 = vmax.f32 %v917_v19, 0.0  ;;  %v1199_v19 = vld [vmem:[#allocation11 + $0x130] sm:$0xff] }
 0x2ec   : > { %1223 = vmatpush.msrb.mxu2 %v1199_v19 }
 0x2ed   : > { %1018 = vmatmul.f32.gmra.mxu0 %v936_v28 }
 0x2f0   : > { %v919_v25 = vpop.f32.mrf.mxu3 }
 0x2f1   : > { %v920_v30 = vadd.f32 %v2480_v29, %v919_v25  ;;  %v1198_v25 = vld [vmem:[#allocation11 + $0x128] sm:$0xff] }
 0x2f2   : > { %1224 = vmatpush.msrb.mxu2 %v1198_v25 }
 0x2f3   : > { %v937_v31 = vmax.f32 %v920_v30, 0.0 }
 0x2f4   : > { %1225 = vmatpush.msrb.mxu2 %v1197_v57 }
 0x2f5   : > { %1021 = vmatmul.f32.gmra.mxu0 %v937_v31 }
 0x2f6   : > { %1226 = vmatpush.msrb.mxu2 %v1196_v37 }
 0x2f8   : > { %1227 = vmatpush.msrb.mxu2 %v1195_v0  ;;  %v1352_v0 = vld [vmem:[#allocation14 + $0x48] sm:$0xff] }
 0x2fa   : > { %v977_v32 = vpop.f32.mrf.mxu0  ;;  %1228 = vmatpush.msrb.mxu2 %v1194_v2 }
 0x2fb   : > { %v978_v36 = vadd.f32 %v2498_v60, %v977_v32 }
 0x2fc   : > { %1229 = vmatpush.msrb.mxu2 %v1193_v51  ;;  %v1351_v51 = vld [vmem:[#allocation14 + $0x40] sm:$0xff] }
 0x2fd   : > { %v2503_v62 = vadd.f32 %v978_v36, %v787_v3 }
 0x2ff   : > { %v1041_v40 = vmax.f32 %v2503_v62, 0.0 }
 0x301   : > { %1127 = vmatmul.f32.vlgmr.msrb.gmra.mxu1 %v1041_v40 }
 0x302   : > { %v980_v29 = vpop.f32.mrf.mxu0 }
 0x303   : > { %v981_v41 = vadd.f32 %v2498_v60, %v980_v29 }
 0x305   : > { %v2511_v44 = vadd.f32 %v981_v41, %v788_v8 }
 0x307   : > { %v1042_v45 = vmax.f32 %v2511_v44, 0.0 }
 0x309   : > { %1130 = vmatmul.f32.gmra.mxu1 %v1042_v45 }
 0x30a   : > { %v983_v1 = vpop.f32.mrf.mxu0 }
 0x30b   : > { %v984_v3 = vadd.f32 %v2498_v60, %v983_v1 }
 0x30d   : > { %v2519_v48 = vadd.f32 %v984_v3, %v789_v13 }
 0x30f   : > { %v1043_v49 = vmax.f32 %v2519_v48, 0.0 }
 0x311   : > { %1133 = vmatmul.f32.gmra.mxu1 %v1043_v49 }
 0x312   : > { %v986_v7 = vpop.f32.mrf.mxu0 }
 0x313   : > { %v987_v8 = vadd.f32 %v2498_v60, %v986_v7 }
 0x315   : > { %v2527_v55 = vadd.f32 %v987_v8, %v790_v17 }
 0x317   : > { %v1044_v59 = vmax.f32 %v2527_v55, 0.0 }
 0x319   : > { %1136 = vmatmul.f32.gmra.mxu1 %v1044_v59 }
 0x31a   : > { %v989_v11 = vpop.f32.mrf.mxu0 }
 0x31b   : > { %v990_v13 = vadd.f32 %v2498_v60, %v989_v11 }
 0x31d   : > { %v2535_v12 = vadd.f32 %v990_v13, %v791_v22 }
 0x31f   : > { %v1045_v33 = vmax.f32 %v2535_v12, 0.0 }
 0x321   : > { %1139 = vmatmul.f32.gmra.mxu1 %v1045_v33 }
 0x322   : > { %v992_v16 = vpop.f32.mrf.mxu0 }
 0x323   : > { %v993_v17 = vadd.f32 %v2498_v60, %v992_v16 }
 0x325   : > { %v2543_v5 = vadd.f32 %v993_v17, %v792_v27 }
 0x327   : > { %v1046_v18 = vmax.f32 %v2543_v5, 0.0 }
 0x329   : > { %1142 = vmatmul.f32.gmra.mxu1 %v1046_v18 }
 0x32a   : > { %v995_v21 = vpop.f32.mrf.mxu0 }
 0x32b   : > { %v996_v22 = vadd.f32 %v2498_v60, %v995_v21 }
 0x32d   : > { %v2551_v15 = vadd.f32 %v996_v22, %v793_v35 }
 0x32f   : > { %v1047_v24 = vmax.f32 %v2551_v15, 0.0 }
 0x331   : > { %1145 = vmatmul.f32.gmra.mxu1 %v1047_v24 }
 0x332   : > { %v998_v26 = vpop.f32.mrf.mxu0 }
 0x333   : > { %v999_v27 = vadd.f32 %v2498_v60, %v998_v26 }
 0x335   : > { %v2559_v28 = vadd.f32 %v999_v27, %v794_v39 }
 0x337   : > { %v1048_v56 = vmax.f32 %v2559_v28, 0.0 }
 0x339   : > { %1148 = vmatmul.f32.gmra.mxu1 %v1048_v56 }
 0x33a   : > { %v1001_v34 = vpop.f32.mrf.mxu0 }
 0x33b   : > { %v1002_v35 = vadd.f32 %v2498_v60, %v1001_v34  ;;  %v1354_v34 = vld [vmem:[#allocation14 + $0x58] sm:$0xff] }
 0x33d   : > { %v2567_v30 = vadd.f32 %v1002_v35, %v795_v43 }
 0x33f   : > { %v1049_v31 = vmax.f32 %v2567_v30, 0.0 }
 0x341   : > { %1151 = vmatmul.f32.gmra.mxu1 %v1049_v31 }
 0x342   : > { %v1004_v38 = vpop.f32.mrf.mxu0 }
 0x343   : > { %v1005_v39 = vadd.f32 %v2498_v60, %v1004_v38 }
 0x345   : > { %v2575_v32 = vadd.f32 %v1005_v39, %v796_v47  ;;  %v1353_v39 = vld [vmem:[#allocation14 + $0x50] sm:$0xff] }
 0x347   : > { %v1050_v36 = vmax.f32 %v2575_v32, 0.0 }
 0x349   : > { %1154 = vmatmul.f32.gmra.mxu1 %v1050_v36 }
 0x34a   : > { %v1007_v42 = vpop.f32.mrf.mxu0 }
 0x34b   : > { %v1008_v43 = vadd.f32 %v2498_v60, %v1007_v42 }
 0x34d   : > { %v2583_v29 = vadd.f32 %v1008_v43, %v797_v53 }
 0x34f   : > { %v1051_v41 = vmax.f32 %v2583_v29, 0.0 }
 0x351   : > { %1157 = vmatmul.f32.gmra.mxu1 %v1051_v41 }
 0x352   : > { %v1010_v46 = vpop.f32.mrf.mxu0 }
 0x353   : > { %v1011_v47 = vadd.f32 %v2498_v60, %v1010_v46 }
 0x355   : > { %v2591_v1 = vadd.f32 %v1011_v47, %v798_v63 }
 0x357   : > { %v1052_v3 = vmax.f32 %v2591_v1, 0.0 }
 0x359   : > { %1160 = vmatmul.f32.gmra.mxu1 %v1052_v3 }
 0x35a   : > { %v1013_v53 = vpop.f32.mrf.mxu0 }
 0x35b   : > { %v1014_v7 = vadd.f32 %v2498_v60, %v1013_v53 }
 0x35d   : > { %v2599_v8 = vadd.f32 %v1014_v7, %v799_v9 }
 0x35f   : > { %v1053_v61 = vmax.f32 %v2599_v8, 0.0 }
 0x361   : > { %1163 = vmatmul.f32.gmra.mxu1 %v1053_v61 }
 0x362   : > { %v1016_v63 = vpop.f32.mrf.mxu0 }
 0x363   : > { %v1017_v6 = vadd.f32 %v2498_v60, %v1016_v63 }
 0x365   : > { %v2607_v11 = vadd.f32 %v1017_v6, %v800_v14  ;;  %v1350_v6 = vld [vmem:[#allocation14 + $0x38] sm:$0xff] }
 0x367   : > { %v1054_v13 = vmax.f32 %v2607_v11, 0.0  ;;  %v1740_v11 = vld [vmem:[%s2764_s8] ss:$0 sm:$0xff] }
 0x369   : > { %1166 = vmatmul.f32.gmra.mxu1 %v1054_v13 }
 0x36a   : > { %v1019_v50 = vpop.f32.mrf.mxu0 }
 0x36b   : > { %v1020_v9 = vadd.f32 %v2498_v60, %v1019_v50 }
 0x36d   : > { %v2615_v16 = vadd.f32 %v1020_v9, %v801_v20  ;;  %v1356_v20 = vld [vmem:[#allocation14 + $0x68] sm:$0xff] }
 0x36e   : > { %1365 = vmatpush.msrb.mxu3 %v1356_v20 }
 0x36f   : > { %v1055_v17 = vmax.f32 %v2615_v16, 0.0 }
 0x370   : > { %1366 = vmatpush.msrb.mxu3 %v1355_v23 }
 0x371   : > { %1169 = vmatmul.f32.gmra.mxu1 %v1055_v17 }
 0x372   : > { %v1022_v52 = vpop.f32.mrf.mxu0  ;;  %1367 = vmatpush.msrb.mxu3 %v1354_v34 }
 0x373   : > { %v1023_v14 = vadd.f32 %v2498_v60, %v1022_v52  ;;  %v1349_v52 = vld [vmem:[#allocation14 + $0x30] sm:$0xff] }
 0x374   : > { %1368 = vmatpush.msrb.mxu3 %v1353_v39 }
 0x375   : > { %v2623_v21 = vadd.f32 %v1023_v14, %v802_v58 }
 0x376   : > { %1369 = vmatpush.msrb.mxu3 %v1352_v0 }
 0x377   : > { %v1056_v22 = vmax.f32 %v2623_v21, 0.0 }
 0x378   : > { %1370 = vmatpush.msrb.mxu3 %v1351_v51 }
 0x379   : > { %1172 = vmatmul.f32.gmra.mxu1 %v1056_v22 }
 0x37a   : > { %1371 = vmatpush.msrb.mxu3 %v1350_v6 }
 0x37c   : > { %1372 = vmatpush.msrb.mxu3 %v1349_v52 }
 0x37e   : > { %v1128_v19 = vpop.f32.mrf.mxu1 }
 0x37f   : > { %v1129_v60 = vadd.f32 %v2631_v54, %v1128_v19  ;;  %v1348_v19 = vld [vmem:[#allocation14 + $0x28] sm:$0xff] }
 0x380   : > { %1373 = vmatpush.msrb.mxu3 %v1348_v19 }
 0x381   : > { %v1176_v26 = vmax.f32 %v1129_v60, 0.0 }
 0x383   : > { %1230 = vmatmul.f32.vlgmr.msrb.gmra.mxu2 %v1176_v26 }
 0x386   : > { %v1131_v58 = vpop.f32.mrf.mxu1 }
 0x387   : > { %v1132_v27 = vadd.f32 %v2631_v54, %v1131_v58  ;;  %v1347_v58 = vld [vmem:[#allocation14 + $0x20] sm:$0xff] }
 0x388   : > { %1374 = vmatpush.msrb.mxu3 %v1347_v58 }
 0x389   : > { %v1177_v25 = vmax.f32 %v1132_v27, 0.0 }
 0x38b   : > { %1233 = vmatmul.f32.gmra.mxu2 %v1177_v25 }
 0x38e   : > { %v1134_v35 = vpop.f32.mrf.mxu1 }
 0x38f   : > { %v1135_v57 = vadd.f32 %v2631_v54, %v1134_v35  ;;  %v1346_v35 = vld [vmem:[#allocation14 + $0x18] sm:$0xff] }
 0x390   : > { %1375 = vmatpush.msrb.mxu3 %v1346_v35 }
 0x391   : > { %v1178_v38 = vmax.f32 %v1135_v57, 0.0 }
 0x393   : > { %1236 = vmatmul.f32.gmra.mxu2 %v1178_v38 }
 0x396   : > { %v1137_v37 = vpop.f32.mrf.mxu1 }
 0x397   : > { %v1138_v42 = vadd.f32 %v2631_v54, %v1137_v37  ;;  %v1345_v37 = vld [vmem:[#allocation14 + $0x10] sm:$0xff] }
 0x398   : > { %1376 = vmatpush.msrb.mxu3 %v1345_v37 }
 0x399   : > { %v1179_v43 = vmax.f32 %v1138_v42, 0.0 }
 0x39b   : > { %1239 = vmatmul.f32.gmra.mxu2 %v1179_v43 }
 0x39e   : > { %v1140_v46 = vpop.f32.mrf.mxu1 }
 0x39f   : > { %v1141_v47 = vadd.f32 %v2631_v54, %v1140_v46  ;;  %v1344_v46 = vld [vmem:[#allocation14 + $0x8] sm:$0xff] }
 0x3a0   : > { %1377 = vmatpush.msrb.mxu3 %v1344_v46 }
 0x3a1   : > { %v1180_v2 = vmax.f32 %v1141_v47, 0.0  ;;  %v1343_v47 = vld [vmem:[#allocation14] sm:$0xff] }
 0x3a2   : > { %1378 = vmatpush.msrb.mxu3 %v1343_v47 }
 0x3a3   : > { %1242 = vmatmul.f32.gmra.mxu2 %v1180_v2 }
 0x3a6   : > { %v1143_v53 = vpop.f32.mrf.mxu1 }
 0x3a7   : > { %v1144_v7 = vadd.f32 %v2631_v54, %v1143_v53 }
 0x3a9   : > { %v1181_v63 = vmax.f32 %v1144_v7, 0.0 }
 0x3ab   : > { %1245 = vmatmul.f32.gmra.mxu2 %v1181_v63 }
 0x3ae   : > { %v1146_v50 = vpop.f32.mrf.mxu1 }
 0x3af   : > { %v1147_v9 = vadd.f32 %v2631_v54, %v1146_v50 }
 0x3b1   : > { %v1182_v4 = vmax.f32 %v1147_v9, 0.0 }
 0x3b3   : > { %1248 = vmatmul.f32.gmra.mxu2 %v1182_v4 }
 0x3b6   : > { %v1149_v14 = vpop.f32.mrf.mxu1 }
 0x3b7   : > { %v1150_v10 = vadd.f32 %v2631_v54, %v1149_v14 }
 0x3b9   : > { %v1183_v20 = vmax.f32 %v1150_v10, 0.0 }
 0x3bb   : > { %1251 = vmatmul.f32.gmra.mxu2 %v1183_v20  ;;  %v2649_v20 = vld [vmem:[#allocation12 + $0x2] ss:$0 sm:$0xff] }
 0x3be   : > { %v1152_v60 = vpop.f32.mrf.mxu1 }
 0x3bf   : > { %v1153_v26 = vadd.f32 %v2631_v54, %v1152_v60 }
 0x3c1   : > { %v1184_v23 = vmax.f32 %v1153_v26, 0.0 }
 0x3c3   : > { %1254 = vmatmul.f32.gmra.mxu2 %v1184_v23 }
 0x3c6   : > { %v1155_v27 = vpop.f32.mrf.mxu1 }
 0x3c7   : > { %v1156_v25 = vadd.f32 %v2631_v54, %v1155_v27 }
 0x3c9   : > { %v1185_v34 = vmax.f32 %v1156_v25, 0.0 }
 0x3cb   : > { %1257 = vmatmul.f32.gmra.mxu2 %v1185_v34 }
 0x3ce   : > { %v1158_v57 = vpop.f32.mrf.mxu1 }
 0x3cf   : > { %v1159_v38 = vadd.f32 %v2631_v54, %v1158_v57 }
 0x3d1   : > { %v1186_v39 = vmax.f32 %v1159_v38, 0.0 }
 0x3d3   : > { %1260 = vmatmul.f32.gmra.mxu2 %v1186_v39 }
 0x3d6   : > { %v1161_v42 = vpop.f32.mrf.mxu1 }
 0x3d7   : > { %v1162_v43 = vadd.f32 %v2631_v54, %v1161_v42 }
 0x3d9   : > { %v1187_v0 = vmax.f32 %v1162_v43, 0.0 }
 0x3db   : > { %1263 = vmatmul.f32.gmra.mxu2 %v1187_v0 }
 0x3de   : > { %v1164_v2 = vpop.f32.mrf.mxu1 }
 0x3df   : > { %v1165_v51 = vadd.f32 %v2631_v54, %v1164_v2 }
 0x3e1   : > { %v1188_v53 = vmax.f32 %v1165_v51, 0.0 }
 0x3e3   : > { %1266 = vmatmul.f32.gmra.mxu2 %v1188_v53 }
 0x3e6   : > { %v1167_v7 = vpop.f32.mrf.mxu1 }
 0x3e7   : > { %v1168_v63 = vadd.f32 %v2631_v54, %v1167_v7 }
 0x3e9   : > { %v1189_v6 = vmax.f32 %v1168_v63, 0.0 }
 0x3eb   : > { %1269 = vmatmul.f32.gmra.mxu2 %v1189_v6 }
 0x3ee   : > { %v1170_v50 = vpop.f32.mrf.mxu1 }
 0x3ef   : > { %v1171_v9 = vadd.f32 %v2631_v54, %v1170_v50 }
 0x3f1   : > { %v1190_v4 = vmax.f32 %v1171_v9, 0.0 }
 0x3f3   : > { %1272 = vmatmul.f32.gmra.mxu2 %v1190_v4 }
 0x3f6   : > { %v1173_v52 = vpop.f32.mrf.mxu1 }
 0x3f7   : > { %v1174_v14 = vadd.f32 %v2631_v54, %v1173_v52 }
 0x3f9   : > { %v1191_v10 = vmax.f32 %v1174_v14, 0.0 }
 0x3fb   : > { %1275 = vmatmul.f32.gmra.mxu2 %v1191_v10 }
 0x406   : > { %v1231_v19 = vpop.f32.mrf.mxu2 }
 0x407   : > { %v1232_v60 = vadd.f32 %v2649_v20, %v1231_v19 }
 0x409   : > { %v1279_v26 = vadd.f32 %v1232_v60, %v1041_v40 }
 0x40b   : > { %v1295_v23 = vmax.f32 %v1279_v26, 0.0 }
 0x40d   : > { %1379 = vmatmul.f32.vlgmr.msrb.gmra.mxu3 %v1295_v23 }
 0x40e   : > { %v1234_v58 = vpop.f32.mrf.mxu2 }
 0x40f   : > { %v1235_v27 = vadd.f32 %v2649_v20, %v1234_v58 }
 0x411   : > { %v1280_v25 = vadd.f32 %v1235_v27, %v1042_v45 }
 0x413   : > { %v1296_v34 = vmax.f32 %v1280_v25, 0.0 }
 0x415   : > { %1382 = vmatmul.f32.gmra.mxu3 %v1296_v34 }
 0x416   : > { %v1237_v54 = vpop.f32.mrf.mxu2 }
 0x417   : > { %v1238_v35 = vadd.f32 %v2649_v20, %v1237_v54 }
 0x419   : > { %v1281_v57 = vadd.f32 %v1238_v35, %v1043_v49 }
 0x41b   : > { %v1297_v38 = vmax.f32 %v1281_v57, 0.0 }
 0x41d   : > { %1385 = vmatmul.f32.gmra.mxu3 %v1297_v38 }
 0x41e   : > { %v1240_v62 = vpop.f32.mrf.mxu2 }
 0x41f   : > { %v1241_v40 = vadd.f32 %v2649_v20, %v1240_v62 }
 0x421   : > { %v1282_v39 = vadd.f32 %v1241_v40, %v1044_v59 }
 0x423   : > { %v1298_v37 = vmax.f32 %v1282_v39, 0.0 }
 0x425   : > { %1388 = vmatmul.f32.gmra.mxu3 %v1298_v37 }
 0x426   : > { %v1243_v44 = vpop.f32.mrf.mxu2 }
 0x427   : > { %v1244_v45 = vadd.f32 %v2649_v20, %v1243_v44 }
 0x429   : > { %v1283_v42 = vadd.f32 %v1244_v45, %v1045_v33 }
 0x42b   : > { %v1299_v43 = vmax.f32 %v1283_v42, 0.0 }
 0x42d   : > { %1391 = vmatmul.f32.gmra.mxu3 %v1299_v43 }
 0x42e   : > { %v1246_v48 = vpop.f32.mrf.mxu2 }
 0x42f   : > { %v1247_v49 = vadd.f32 %v2649_v20, %v1246_v48 }
 0x431   : > { %v1284_v0 = vadd.f32 %v1247_v49, %v1046_v18 }
 0x433   : > { %v1300_v46 = vmax.f32 %v1284_v0, 0.0 }
 0x435   : > { %1394 = vmatmul.f32.gmra.mxu3 %v1300_v46 }
 0x436   : > { %v1249_v55 = vpop.f32.mrf.mxu2 }
 0x437   : > { %v1250_v59 = vadd.f32 %v2649_v20, %v1249_v55 }
 0x439   : > { %v1285_v47 = vadd.f32 %v1250_v59, %v1047_v24 }
 0x43b   : > { %v1301_v2 = vmax.f32 %v1285_v47, 0.0 }
 0x43d   : > { %1397 = vmatmul.f32.gmra.mxu3 %v1301_v2 }
 0x43e   : > { %v1252_v12 = vpop.f32.mrf.mxu2 }
 0x43f   : > { %v1253_v33 = vadd.f32 %v2649_v20, %v1252_v12 }
 0x441   : > { %v1286_v51 = vadd.f32 %v1253_v33, %v1048_v56 }
 0x443   : > { %v1302_v53 = vmax.f32 %v1286_v51, 0.0 }
 0x445   : > { %1400 = vmatmul.f32.gmra.mxu3 %v1302_v53 }
 0x446   : > { %v1255_v5 = vpop.f32.mrf.mxu2 }
 0x447   : > { %v1256_v18 = vadd.f32 %v2649_v20, %v1255_v5 }
 0x449   : > { %v1287_v7 = vadd.f32 %v1256_v18, %v1049_v31 }
 0x44b   : > { %v1303_v63 = vmax.f32 %v1287_v7, 0.0 }
 0x44d   : > { %1403 = vmatmul.f32.gmra.mxu3 %v1303_v63 }
 0x44e   : > { %v1258_v15 = vpop.f32.mrf.mxu2 }
 0x44f   : > { %v1259_v24 = vadd.f32 %v2649_v20, %v1258_v15 }
 0x451   : > { %v1288_v6 = vadd.f32 %v1259_v24, %v1050_v36 }
 0x453   : > { %v1304_v50 = vmax.f32 %v1288_v6, 0.0 }
 0x455   : > { %1406 = vmatmul.f32.gmra.mxu3 %v1304_v50 }
 0x456   : > { %v1261_v28 = vpop.f32.mrf.mxu2 }
 0x457   : > { %v1262_v56 = vadd.f32 %v2649_v20, %v1261_v28 }
 0x459   : > { %v1289_v9 = vadd.f32 %v1262_v56, %v1051_v41 }
 0x45b   : > { %v1305_v4 = vmax.f32 %v1289_v9, 0.0 }
 0x45d   : > { %1409 = vmatmul.f32.gmra.mxu3 %v1305_v4 }
 0x45e   : > { %v1264_v30 = vpop.f32.mrf.mxu2 }
 0x45f   : > { %v1265_v31 = vadd.f32 %v2649_v20, %v1264_v30 }
 0x461   : > { %v1290_v52 = vadd.f32 %v1265_v31, %v1052_v3 }
 0x463   : > { %v1306_v14 = vmax.f32 %v1290_v52, 0.0 }
 0x465   : > { %1412 = vmatmul.f32.gmra.mxu3 %v1306_v14 }
 0x466   : > { %v1267_v32 = vpop.f32.mrf.mxu2 }
 0x467   : > { %v1268_v36 = vadd.f32 %v2649_v20, %v1267_v32 }
 0x469   : > { %v1291_v10 = vadd.f32 %v1268_v36, %v1053_v61 }
 0x46b   : > { %v1307_v19 = vmax.f32 %v1291_v10, 0.0 }
 0x46d   : > { %1415 = vmatmul.f32.gmra.mxu3 %v1307_v19 }
 0x46e   : > { %v1270_v29 = vpop.f32.mrf.mxu2 }
 0x46f   : > { %v1271_v41 = vadd.f32 %v2649_v20, %v1270_v29 }
 0x471   : > { %v1292_v60 = vadd.f32 %v1271_v41, %v1054_v13 }
 0x473   : > { %v1308_v26 = vmax.f32 %v1292_v60, 0.0 }
 0x475   : > { %1418 = vmatmul.f32.gmra.mxu3 %v1308_v26 }
 0x476   : > { %v1273_v1 = vpop.f32.mrf.mxu2 }
 0x477   : > { %v1274_v3 = vadd.f32 %v2649_v20, %v1273_v1 }
 0x479   : > { %v1293_v23 = vadd.f32 %v1274_v3, %v1055_v17 }
 0x47b   : > { %v1309_v58 = vmax.f32 %v1293_v23, 0.0 }
 0x47d   : > { %1421 = vmatmul.f32.gmra.mxu3 %v1309_v58 }
 0x47e   : > { %v1276_v8 = vpop.f32.mrf.mxu2 }
 0x47f   : > { %v1277_v61 = vadd.f32 %v2649_v20, %v1276_v8 }
 0x481   : > { %v1294_v27 = vadd.f32 %v1277_v61, %v1056_v22 }
 0x483   : > { %v1310_v25 = vmax.f32 %v1294_v27, 0.0 }
 0x485   : > { %1424 = vmatmul.f32.gmra.mxu3 %v1310_v25 }
 0x490   : > { %v1380_v13 = vpop.f32.mrf.mxu3 }
 0x491   : > { %v1381_v34 = vadd.f32 %v1740_v11, %v1380_v13 }
 0x493   : > { %1428 = vst [vmem:[%s2704_s1] sm:$0xff] %v1381_v34 }
 0x498   : > { %v1383_v16 = vpop.f32.mrf.mxu3 }
 0x499   : > { %v1384_v17 = vadd.f32 %v1740_v11, %v1383_v16 }
 0x49b   : > { %1429 = vst [vmem:[%s2704_s1 + $0x8] sm:$0xff] %v1384_v17 }
 0x4a0   : > { %v1386_v21 = vpop.f32.mrf.mxu3 }
 0x4a1   : > { %v1387_v22 = vadd.f32 %v1740_v11, %v1386_v21 }
 0x4a3   : > { %1430 = vst [vmem:[%s2704_s1 + $0x10] sm:$0xff] %v1387_v22 }
 0x4a8   : > { %v1389_v20 = vpop.f32.mrf.mxu3 }
 0x4a9   : > { %v1390_v54 = vadd.f32 %v1740_v11, %v1389_v20 }
 0x4ab   : > { %1431 = vst [vmem:[%s2704_s1 + $0x18] sm:$0xff] %v1390_v54 }
 0x4b0   : > { %v1392_v35 = vpop.f32.mrf.mxu3 }
 0x4b1   : > { %v1393_v57 = vadd.f32 %v1740_v11, %v1392_v35 }
 0x4b3   : > { %1432 = vst [vmem:[%s2704_s1 + $0x20] sm:$0xff] %v1393_v57 }
 0x4b8   : > { %v1395_v38 = vpop.f32.mrf.mxu3 }
 0x4b9   : > { %v1396_v62 = vadd.f32 %v1740_v11, %v1395_v38 }
 0x4bb   : > { %1433 = vst [vmem:[%s2704_s1 + $0x28] sm:$0xff] %v1396_v62 }
 0x4c0   : > { %v1398_v40 = vpop.f32.mrf.mxu3 }
 0x4c1   : > { %v1399_v39 = vadd.f32 %v1740_v11, %v1398_v40 }
 0x4c3   : > { %1434 = vst [vmem:[%s2704_s1 + $0x30] sm:$0xff] %v1399_v39 }
 0x4c8   : > { %v1401_v37 = vpop.f32.mrf.mxu3 }
 0x4c9   : > { %v1402_v44 = vadd.f32 %v1740_v11, %v1401_v37 }
 0x4cb   : > { %1435 = vst [vmem:[%s2704_s1 + $0x38] sm:$0xff] %v1402_v44 }
 0x4d0   : > { %v1404_v45 = vpop.f32.mrf.mxu3 }
 0x4d1   : > { %v1405_v42 = vadd.f32 %v1740_v11, %v1404_v45 }
 0x4d3   : > { %1436 = vst [vmem:[%s2704_s1 + $0x40] sm:$0xff] %v1405_v42 }
 0x4d8   : > { %v1407_v43 = vpop.f32.mrf.mxu3 }
 0x4d9   : > { %v1408_v48 = vadd.f32 %v1740_v11, %v1407_v43 }
 0x4db   : > { %1437 = vst [vmem:[%s2704_s1 + $0x48] sm:$0xff] %v1408_v48 }
 0x4e0   : > { %v1410_v49 = vpop.f32.mrf.mxu3 }
 0x4e1   : > { %v1411_v0 = vadd.f32 %v1740_v11, %v1410_v49 }
 0x4e3   : > { %1438 = vst [vmem:[%s2704_s1 + $0x50] sm:$0xff] %v1411_v0 }
 0x4e8   : > { %v1413_v46 = vpop.f32.mrf.mxu3 }
 0x4e9   : > { %v1414_v55 = vadd.f32 %v1740_v11, %v1413_v46 }
 0x4eb   : > { %1439 = vst [vmem:[%s2704_s1 + $0x58] sm:$0xff] %v1414_v55 }
 0x4f0   : > { %v1416_v59 = vpop.f32.mrf.mxu3 }
 0x4f1   : > { %v1417_v47 = vadd.f32 %v1740_v11, %v1416_v59 }
 0x4f3   : > { %1440 = vst [vmem:[%s2704_s1 + $0x60] sm:$0xff] %v1417_v47 }
 0x4f8   : > { %v1419_v2 = vpop.f32.mrf.mxu3 }
 0x4f9   : > { %v1420_v12 = vadd.f32 %v1740_v11, %v1419_v2 }
 0x4fb   : > { %1441 = vst [vmem:[%s2704_s1 + $0x68] sm:$0xff] %v1420_v12 }
 0x500   : > { %v1422_v33 = vpop.f32.mrf.mxu3 }
 0x501   : > { %v1423_v51 = vadd.f32 %v1740_v11, %v1422_v33 }
 0x503   : > { %1442 = vst [vmem:[%s2704_s1 + $0x70] sm:$0xff] %v1423_v51 }
 0x508   : > { %v1425_v53 = vpop.f32.mrf.mxu3 }
 0x509   : > { %v1426_v5 = vadd.f32 %v1740_v11, %v1425_v53 }
 0x50b   : > { %1443 = vst [vmem:[%s2704_s1 + $0x78] sm:$0xff] %v1426_v5 }
 0x50c   : > { %1978 = shalt.err (!%p1975_p9)
}
 0x50d   : > { %s2041_s25 = smov 128   ;;  %s2042_s20 = smov 8  }
 0x50e   : > { %1646 = dma.vmem_to_hbm [thread:$0]  (%p2202_p4), %s1458_s5, 2048, %s1460_s26, %s1445_s17, %s2041_s25, %s2041_s25, %s2042_s20  }
 0x50f PF: > { %s1474_s1 = sand.u32 1, %s2017_s30   ;;  %p2785_p10 = scmp.ge.s32.totalorder %s2029_s12, 2 }
 0x510   : > { %s1475_s23 = scalar_lea.sflag [#allocation5], %s1474_s1 }
 0x511   : > { %p1672_p13 = pnand %p2785_p10, %p2206_p6 }
 0x513   : > { %p1673_p11 = pneg %p1672_p13 }
 0x515   : > { %2012 = dma.done.wait (%p1673_p11), %s1475_s23, 2048  }
 0x516   : > { %2014 = vsyncadd (%p1673_p11), %s1475_s23, 4294965248  ;;  %p25_p0 = scmp.ge.s32.totalorder %s2176_s24, 4   ;;  %s2786_s30 = smov %s2021_s10 }
 0x517   : > { %s2787_s10 = smov %s2025_s11  ;;  %s2788_s11 = smov %s2187_s15 }
 0x518   : > { %s2789_s12 = smov %s2176_s24  ;;  %27 = sbr.rel (!%p25_p0) target bundleno = 13 (0xd), region = 133 }
 0x51d   :  { %1481 = vsyncpa [#allocation4], 1 }
 0x51e   :  { %1483 = vsyncpa [#allocation4 + $0x1], 1 }
 0x51f   :  { %1484 = vsyncpa [#allocation7], 1 }
 0x520   :  { %1485 = vsyncpa [#allocation10], 1 }
 0x521   :  { %1486 = vsyncpa [#allocation13], 1 }
 0x522   :  { %1487 = vsyncpa [#allocation5], 1 }
 0x523   :  { %1489 = vsyncpa [#allocation5 + $0x1], 1 }

</bundles_post_ra>
